<compile_context>
chip_gen: v7x
topology: tpu7x:2x2x1
jax: 0.10.0
libtpu: 0.0.40
codegen_flags: <defaults>
</compile_context>

<pallas_src>
import math

import jax
import jax.numpy as jnp
from jax.experimental import pallas as pl
from jax.experimental.pallas import tpu as pltpu

# ---- small synthetic DistilBERT config ----
B = 2            # batch
S = 8            # sequence length
H = 32           # hidden size
N_HEADS = 2
DH = H // N_HEADS
FFN = 64         # intermediate (4*H)
N_LAYERS = 2
VOCAB = 50
MAX_POS = 16
NUM_LABELS = 2
EPS = 1e-12      # DistilBERT LayerNorm eps
BS = B * S
MASK_MIN = float(jnp.finfo(jnp.float32).min)   # torch.finfo(float32).min


# -------------------- in-kernel helpers --------------------
def _layernorm(x, gamma, beta):
    mu = jnp.mean(x, axis=-1, keepdims=True)
    xc = x - mu
    var = jnp.mean(xc * xc, axis=-1, keepdims=True)
    return xc * jax.lax.rsqrt(var + EPS) * gamma + beta


def _gelu(x):
    # TODO(synk): HF DistilBERT uses exact erf-GELU; tanh approximation used
    # here (no guaranteed Mosaic lowering for erf), max abs deviation ~1e-3.
    c = math.sqrt(2.0 / math.pi)
    return 0.5 * x * (1.0 + jnp.tanh(c * (x + 0.044715 * x * x * x)))


# -------------------- fused forward kernel --------------------
def fused_forward_kernel(ids_ref, allow_ref, pool_ref,
                         wemb_ref, pos_ref, embln_ref,
                         wqkv_ref, bqkv_ref, wo_ref, w1_ref, b1_ref, w2_ref,
                         vecs_ref, wc_ref, bc_ref,
                         o_ref):
    # ---- embeddings: gather-as-matmul + position add + LayerNorm ----
    ids = ids_ref[...]                                            # (BS, 1) int32
    vocab_iota = jax.lax.broadcasted_iota(jnp.int32, (BS, VOCAB), 1)
    onehot = (ids == vocab_iota).astype(jnp.float32)              # (BS, VOCAB)
    x = (jnp.dot(onehot, wemb_ref[...], preferred_element_type=jnp.float32)
         + pos_ref[...])                                          # (BS, H)
    x = _layernorm(x, embln_ref[0:1, :], embln_ref[1:2, :])

    allow = allow_ref[...]                                        # (BS, BS) 1/0

    # ---- transformer layers (static unroll; all weights VMEM-resident) ----
    for l in range(N_LAYERS):
        vl = vecs_ref[l]                                          # (6, H) packed
        # fused Q/K/V projection (attention scale pre-folded into Q)
        qkv = (jnp.dot(x, wqkv_ref[l], preferred_element_type=jnp.float32)
               + bqkv_ref[l])                                     # (BS, 3H)
        ctx = []
        for h in range(N_HEADS):                                  # static heads
            q = qkv[:, h * DH:(h + 1) * DH]
            k = qkv[:, H + h * DH:H + (h + 1) * DH]
            v = qkv[:, 2 * H + h * DH:2 * H + (h + 1) * DH]
            s = jax.lax.dot_general(q, k, (((1,), (1,)), ((), ())),
                                    preferred_element_type=jnp.float32)  # (BS,BS)
            s = jnp.where(allow > 0.0, s, MASK_MIN)               # masked_fill
            s = s - jnp.max(s, axis=-1, keepdims=True)
            p = jnp.exp(s)
            p = p / jnp.sum(p, axis=-1, keepdims=True)
            ctx.append(jnp.dot(p, v, preferred_element_type=jnp.float32))
        ctx = jnp.concatenate(ctx, axis=-1)                       # (BS, H)
        attn = (jnp.dot(ctx, wo_ref[l], preferred_element_type=jnp.float32)
                + vl[0:1, :])                                     # + bo
        x = _layernorm(x + attn, vl[1:2, :], vl[2:3, :])          # sa_layer_norm

        f = jnp.dot(x, w1_ref[l], preferred_element_type=jnp.float32) + b1_ref[l]
        f = _gelu(f)
        f = jnp.dot(f, w2_ref[l], preferred_element_type=jnp.float32) + vl[3:4, :]
        x = _layernorm(x + f, vl[4:5, :], vl[5:6, :])             # output_layer_norm

    # ---- mean pool over seq (as matmul) + classifier; dropout = eval no-op ----
    pooled = jnp.dot(pool_ref[...], x, preferred_element_type=jnp.float32)  # (B, H)
    o_ref[...] = (jnp.dot(pooled, wc_ref[...], preferred_element_type=jnp.float32)
                  + bc_ref[...])


# -------------------- wrapper --------------------
def distilbert_cls_forward(params, input_ids, attention_mask):
    # layout plumbing only: reshape ids, tile positions, build mask / pool mats
    ids = input_ids.reshape(BS, 1).astype(jnp.int32)
    pos_bs = jnp.tile(params["pos_emb"][:S], (B, 1))                       # (BS, H)
    key_keep = attention_mask.reshape(1, BS).astype(jnp.float32)           # (1, BS)
    same_batch = jnp.kron(jnp.eye(B, dtype=jnp.float32),
                          jnp.ones((S, S), jnp.float32))                   # (BS, BS)
    allow = same_batch * key_keep                                          # block-diag
    pool = jnp.kron(jnp.eye(B, dtype=jnp.float32),
                    jnp.full((1, S), 1.0 / S, jnp.float32))                # (B, BS)

    vmem = pl.BlockSpec(memory_space=pltpu.MemorySpace.VMEM)
    args = (ids, allow, pool,
            params["word_emb"], pos_bs, params["emb_ln"],
            params["wqkv"], params["bqkv"], params["wo"],
            params["w1"], params["b1"], params["w2"],
            params["vecs"], params["wc"], params["bc"])
    return pl.pallas_call(
        fused_forward_kernel,
        out_shape=jax.ShapeDtypeStruct((B, NUM_LABELS), jnp.float32),
        in_specs=[vmem] * len(args),
        out_specs=vmem,
    )(*args)


# -------------------- parameter init (deterministic, synthetic) --------------------
def init_params(key):
    def normal(k, shape, std=0.02):
        return (jax.random.normal(k, shape, jnp.float32) * std).astype(jnp.float32)

    keys = iter(jax.random.split(key, 8 + N_LAYERS * 16))
    scale = 1.0 / math.sqrt(DH)

    word_emb = normal(next(keys), (VOCAB, H))
    pos_emb = normal(next(keys), (MAX_POS, H))
    emb_ln = jnp.concatenate([1.0 + normal(next(keys), (1, H), 0.01),
                              normal(next(keys), (1, H), 0.01)], axis=0)    # (2, H)

    wqkv, bqkv, wo, w1, b1, w2, vecs = [], [], [], [], [], [], []
    for _ in range(N_LAYERS):
        wq, bq = normal(next(keys), (H, H)), normal(next(keys), (1, H))
        wk, bk = normal(next(keys), (H, H)), normal(next(keys), (1, H))
        wv, bv = normal(next(keys), (H, H)), normal(next(keys), (1, H))
        wo_l, bo = normal(next(keys), (H, H)), normal(next(keys), (1, H))
        g1 = 1.0 + normal(next(keys), (1, H), 0.01)
        be1 = normal(next(keys), (1, H), 0.01)
        w1_l, b1_l = normal(next(keys), (H, FFN)), normal(next(keys), (1, FFN))
        w2_l, b2_l = normal(next(keys), (FFN, H)), normal(next(keys), (1, H))
        g2 = 1.0 + normal(next(keys), (1, H), 0.01)
        be2 = normal(next(keys), (1, H), 0.01)
        # fold 1/sqrt(DH) into the Q projection; fuse Q/K/V into one matmul
        wqkv.append(jnp.concatenate([wq * scale, wk, wv], axis=1))          # (H, 3H)
        bqkv.append(jnp.concatenate([bq * scale, bk, bv], axis=1))          # (1, 3H)
        wo.append(wo_l)
        w1.append(w1_l)
        b1.append(b1_l)
        w2.append(w2_l)
        # pack the small per-layer vectors: bo, g1, be1, b2, g2, be2
        vecs.append(jnp.concatenate([bo, g1, be1, b2_l, g2, be2], axis=0))  # (6, H)

    xavier_std = math.sqrt(2.0 / (H + NUM_LABELS))
    return {
        "word_emb": word_emb, "pos_emb": pos_emb, "emb_ln": emb_ln,
        "wqkv": jnp.stack(wqkv), "bqkv": jnp.stack(bqkv), "wo": jnp.stack(wo),
        "w1": jnp.stack(w1), "b1": jnp.stack(b1), "w2": jnp.stack(w2),
        "vecs": jnp.stack(vecs),
        "wc": normal(next(keys), (H, NUM_LABELS), xavier_std),
        "bc": normal(next(keys), (1, NUM_LABELS), 0.01),
    }


if __name__ == "__main__":
    key = jax.random.PRNGKey(0)
    kp, kid = jax.random.split(key)
    params = init_params(kp)
    input_ids = jax.random.randint(kid, (B, S), 0, VOCAB, dtype=jnp.int32)
    attention_mask = jnp.ones((B, S), dtype=jnp.int32)

    logits = jax.jit(distilbert_cls_forward)(params, input_ids, attention_mask)
    jax.block_until_ready(logits)
    assert logits.shape == (B, NUM_LABELS) and logits.dtype == jnp.float32
    print("KERNEL_OK")
</pallas_src>

<mosaic_0001>
module attributes {stable_mosaic.version = 11 : i64} {
  func.func @fused_forward_kernel(%arg0: memref<16x1xi32, #tpu.memory_space<vmem>>, %arg1: memref<16x16xf32, #tpu.memory_space<vmem>>, %arg2: memref<2x16xf32, #tpu.memory_space<vmem>>, %arg3: memref<50x32xf32, #tpu.memory_space<vmem>>, %arg4: memref<16x32xf32, #tpu.memory_space<vmem>>, %arg5: memref<2x32xf32, #tpu.memory_space<vmem>>, %arg6: memref<2x32x96xf32, #tpu.memory_space<vmem>>, %arg7: memref<2x1x96xf32, #tpu.memory_space<vmem>>, %arg8: memref<2x32x32xf32, #tpu.memory_space<vmem>>, %arg9: memref<2x32x64xf32, #tpu.memory_space<vmem>>, %arg10: memref<2x1x64xf32, #tpu.memory_space<vmem>>, %arg11: memref<2x64x32xf32, #tpu.memory_space<vmem>>, %arg12: memref<2x6x32xf32, #tpu.memory_space<vmem>>, %arg13: memref<32x2xf32, #tpu.memory_space<vmem>>, %arg14: memref<1x2xf32, #tpu.memory_space<vmem>>, %arg15: memref<2x2xf32, #tpu.memory_space<vmem>>) attributes {dimension_semantics = [], scalar_prefetch = 0 : i64, scratch_operands = 0 : i64, tpu.core_type = #tpu.core_type<tc>} {
    %c0 = arith.constant 0 : index
    %c0_0 = arith.constant 0 : index
    %0 = vector.load %arg0[%c0, %c0_0] : memref<16x1xi32, #tpu.memory_space<vmem>>, vector<16x1xi32>
    %1 = tpu.iota {dimensions = array<i32: 1>} : vector<16x50xi32>
    %2 = vector.broadcast %0 : vector<16x1xi32> to vector<16x50xi32>
    %3 = arith.cmpi eq, %2, %1 : vector<16x50xi32>
    %4 = arith.extui %3 : vector<16x50xi1> to vector<16x50xi32>
    %5 = arith.sitofp %4 : vector<16x50xi32> to vector<16x50xf32>
    %c0_1 = arith.constant 0 : index
    %c0_2 = arith.constant 0 : index
    %6 = vector.load %arg3[%c0_1, %c0_2] : memref<50x32xf32, #tpu.memory_space<vmem>>, vector<50x32xf32>
    %cst = arith.constant dense<0.000000e+00> : vector<16x32xf32>
    %7 = tpu.matmul %5, %6, %cst {dimension_numbers = #tpu.dot_dimension_numbers<[1], [0], [0], [1], [0, 0, 1, 1], [], []>} : vector<16x50xf32>, vector<50x32xf32>, vector<16x32xf32> -> vector<16x32xf32>
    %c0_3 = arith.constant 0 : index
    %c0_4 = arith.constant 0 : index
    %8 = vector.load %arg4[%c0_3, %c0_4] : memref<16x32xf32, #tpu.memory_space<vmem>>, vector<16x32xf32>
    %9 = arith.addf %7, %8 : vector<16x32xf32>
    %c0_5 = arith.constant 0 : index
    %c0_6 = arith.constant 0 : index
    %10 = vector.load %arg5[%c0_5, %c0_6] : memref<2x32xf32, #tpu.memory_space<vmem>>, vector<1x32xf32>
    %c1 = arith.constant 1 : index
    %c0_7 = arith.constant 0 : index
    %11 = vector.load %arg5[%c1, %c0_7] : memref<2x32xf32, #tpu.memory_space<vmem>>, vector<1x32xf32>
    %cst_8 = arith.constant dense<0.000000e+00> : vector<16xf32>
    %12 = vector.multi_reduction <add>, %9, %cst_8 [1] : vector<16x32xf32> to vector<16xf32>
    %13 = vector.shape_cast %12 : vector<16xf32> to vector<16x1xf32>
    %cst_9 = arith.constant 3.200000e+01 : f32
    %14 = vector.broadcast %cst_9 : f32 to vector<16x1xf32>
    %15 = arith.divf %13, %14 : vector<16x1xf32>
    %16 = vector.broadcast %15 : vector<16x1xf32> to vector<16x32xf32>
    %17 = arith.subf %9, %16 : vector<16x32xf32>
    %18 = arith.mulf %17, %17 : vector<16x32xf32>
    %cst_10 = arith.constant dense<0.000000e+00> : vector<16xf32>
    %19 = vector.multi_reduction <add>, %18, %cst_10 [1] : vector<16x32xf32> to vector<16xf32>
    %20 = vector.shape_cast %19 : vector<16xf32> to vector<16x1xf32>
    %cst_11 = arith.constant 3.200000e+01 : f32
    %21 = vector.broadcast %cst_11 : f32 to vector<16x1xf32>
    %22 = arith.divf %20, %21 : vector<16x1xf32>
    %cst_12 = arith.constant 9.99999996E-13 : f32
    %23 = vector.broadcast %cst_12 : f32 to vector<16x1xf32>
    %24 = arith.addf %22, %23 : vector<16x1xf32>
    %25 = math.rsqrt %24 : vector<16x1xf32>
    %26 = vector.broadcast %25 : vector<16x1xf32> to vector<16x32xf32>
    %27 = arith.mulf %17, %26 : vector<16x32xf32>
    %28 = vector.broadcast %10 : vector<1x32xf32> to vector<16x32xf32>
    %29 = arith.mulf %27, %28 : vector<16x32xf32>
    %30 = vector.broadcast %11 : vector<1x32xf32> to vector<16x32xf32>
    %31 = arith.addf %29, %30 : vector<16x32xf32>
    %c0_13 = arith.constant 0 : index
    %c0_14 = arith.constant 0 : index
    %32 = vector.load %arg1[%c0_13, %c0_14] : memref<16x16xf32, #tpu.memory_space<vmem>>, vector<16x16xf32>
    %c0_15 = arith.constant 0 : index
    %c0_16 = arith.constant 0 : index
    %c0_17 = arith.constant 0 : index
    %33 = vector.load %arg12[%c0_15, %c0_16, %c0_17] : memref<2x6x32xf32, #tpu.memory_space<vmem>>, vector<1x6x32xf32>
    %34 = vector.shape_cast %33 : vector<1x6x32xf32> to vector<6x32xf32>
    %c0_18 = arith.constant 0 : index
    %c0_19 = arith.constant 0 : index
    %c0_20 = arith.constant 0 : index
    %35 = vector.load %arg6[%c0_18, %c0_19, %c0_20] : memref<2x32x96xf32, #tpu.memory_space<vmem>>, vector<1x32x96xf32>
    %36 = vector.shape_cast %35 : vector<1x32x96xf32> to vector<32x96xf32>
    %cst_21 = arith.constant dense<0.000000e+00> : vector<16x96xf32>
    %37 = tpu.matmul %31, %36, %cst_21 {dimension_numbers = #tpu.dot_dimension_numbers<[1], [0], [0], [1], [0, 0, 1, 1], [], []>} : vector<16x32xf32>, vector<32x96xf32>, vector<16x96xf32> -> vector<16x96xf32>
    %c0_22 = arith.constant 0 : index
    %c0_23 = arith.constant 0 : index
    %c0_24 = arith.constant 0 : index
    %38 = vector.load %arg7[%c0_22, %c0_23, %c0_24] : memref<2x1x96xf32, #tpu.memory_space<vmem>>, vector<1x1x96xf32>
    %39 = vector.shape_cast %38 : vector<1x1x96xf32> to vector<1x96xf32>
    %40 = vector.broadcast %39 : vector<1x96xf32> to vector<16x96xf32>
    %41 = arith.addf %37, %40 : vector<16x96xf32>
    %42 = vector.extract_strided_slice %41 {offsets = [0, 0], sizes = [16, 16], strides = [1, 1]} : vector<16x96xf32> to vector<16x16xf32>
    %43 = vector.extract_strided_slice %41 {offsets = [0, 32], sizes = [16, 16], strides = [1, 1]} : vector<16x96xf32> to vector<16x16xf32>
    %44 = vector.extract_strided_slice %41 {offsets = [0, 64], sizes = [16, 16], strides = [1, 1]} : vector<16x96xf32> to vector<16x16xf32>
    %cst_25 = arith.constant dense<0.000000e+00> : vector<16x16xf32>
    %45 = tpu.matmul %42, %43, %cst_25 {dimension_numbers = #tpu.dot_dimension_numbers<[1], [1], [0], [0], [0, 0, 1, 0], [], []>} : vector<16x16xf32>, vector<16x16xf32>, vector<16x16xf32> -> vector<16x16xf32>
    %cst_26 = arith.constant 0.000000e+00 : f32
    %46 = vector.broadcast %cst_26 : f32 to vector<16x16xf32>
    %47 = arith.cmpf ogt, %32, %46 : vector<16x16xf32>
    %cst_27 = arith.constant -3.40282347E+38 : f32
    %48 = vector.broadcast %cst_27 : f32 to vector<16x16xf32>
    %49 = arith.select %47, %45, %48 : vector<16x16xi1>, vector<16x16xf32>
    %cst_28 = arith.constant dense<0xFF800000> : vector<16xf32>
    %50 = vector.multi_reduction <maximumf>, %49, %cst_28 [1] : vector<16x16xf32> to vector<16xf32>
    %51 = vector.shape_cast %50 : vector<16xf32> to vector<16x1xf32>
    %52 = vector.broadcast %51 : vector<16x1xf32> to vector<16x16xf32>
    %53 = arith.subf %49, %52 : vector<16x16xf32>
    %54 = math.exp %53 : vector<16x16xf32>
    %cst_29 = arith.constant dense<0.000000e+00> : vector<16xf32>
    %55 = vector.multi_reduction <add>, %54, %cst_29 [1] : vector<16x16xf32> to vector<16xf32>
    %56 = vector.shape_cast %55 : vector<16xf32> to vector<16x1xf32>
    %57 = vector.broadcast %56 : vector<16x1xf32> to vector<16x16xf32>
    %58 = arith.divf %54, %57 : vector<16x16xf32>
    %cst_30 = arith.constant dense<0.000000e+00> : vector<16x16xf32>
    %59 = tpu.matmul %58, %44, %cst_30 {dimension_numbers = #tpu.dot_dimension_numbers<[1], [0], [0], [1], [0, 0, 1, 1], [], []>} : vector<16x16xf32>, vector<16x16xf32>, vector<16x16xf32> -> vector<16x16xf32>
    %60 = vector.extract_strided_slice %41 {offsets = [0, 16], sizes = [16, 16], strides = [1, 1]} : vector<16x96xf32> to vector<16x16xf32>
    %61 = vector.extract_strided_slice %41 {offsets = [0, 48], sizes = [16, 16], strides = [1, 1]} : vector<16x96xf32> to vector<16x16xf32>
    %62 = vector.extract_strided_slice %41 {offsets = [0, 80], sizes = [16, 16], strides = [1, 1]} : vector<16x96xf32> to vector<16x16xf32>
    %cst_31 = arith.constant dense<0.000000e+00> : vector<16x16xf32>
    %63 = tpu.matmul %60, %61, %cst_31 {dimension_numbers = #tpu.dot_dimension_numbers<[1], [1], [0], [0], [0, 0, 1, 0], [], []>} : vector<16x16xf32>, vector<16x16xf32>, vector<16x16xf32> -> vector<16x16xf32>
    %cst_32 = arith.constant 0.000000e+00 : f32
    %64 = vector.broadcast %cst_32 : f32 to vector<16x16xf32>
    %65 = arith.cmpf ogt, %32, %64 : vector<16x16xf32>
    %cst_33 = arith.constant -3.40282347E+38 : f32
    %66 = vector.broadcast %cst_33 : f32 to vector<16x16xf32>
    %67 = arith.select %65, %63, %66 : vector<16x16xi1>, vector<16x16xf32>
    %cst_34 = arith.constant dense<0xFF800000> : vector<16xf32>
    %68 = vector.multi_reduction <maximumf>, %67, %cst_34 [1] : vector<16x16xf32> to vector<16xf32>
    %69 = vector.shape_cast %68 : vector<16xf32> to vector<16x1xf32>
    %70 = vector.broadcast %69 : vector<16x1xf32> to vector<16x16xf32>
    %71 = arith.subf %67, %70 : vector<16x16xf32>
    %72 = math.exp %71 : vector<16x16xf32>
    %cst_35 = arith.constant dense<0.000000e+00> : vector<16xf32>
    %73 = vector.multi_reduction <add>, %72, %cst_35 [1] : vector<16x16xf32> to vector<16xf32>
    %74 = vector.shape_cast %73 : vector<16xf32> to vector<16x1xf32>
    %75 = vector.broadcast %74 : vector<16x1xf32> to vector<16x16xf32>
    %76 = arith.divf %72, %75 : vector<16x16xf32>
    %cst_36 = arith.constant dense<0.000000e+00> : vector<16x16xf32>
    %77 = tpu.matmul %76, %62, %cst_36 {dimension_numbers = #tpu.dot_dimension_numbers<[1], [0], [0], [1], [0, 0, 1, 1], [], []>} : vector<16x16xf32>, vector<16x16xf32>, vector<16x16xf32> -> vector<16x16xf32>
    %78 = tpu.concatenate %59, %77 in 1 : vector<16x16xf32>, vector<16x16xf32> -> vector<16x32xf32>
    %c0_37 = arith.constant 0 : index
    %c0_38 = arith.constant 0 : index
    %c0_39 = arith.constant 0 : index
    %79 = vector.load %arg8[%c0_37, %c0_38, %c0_39] : memref<2x32x32xf32, #tpu.memory_space<vmem>>, vector<1x32x32xf32>
    %80 = vector.shape_cast %79 : vector<1x32x32xf32> to vector<32x32xf32>
    %cst_40 = arith.constant dense<0.000000e+00> : vector<16x32xf32>
    %81 = tpu.matmul %78, %80, %cst_40 {dimension_numbers = #tpu.dot_dimension_numbers<[1], [0], [0], [1], [0, 0, 1, 1], [], []>} : vector<16x32xf32>, vector<32x32xf32>, vector<16x32xf32> -> vector<16x32xf32>
    %82 = vector.extract_strided_slice %34 {offsets = [0, 0], sizes = [1, 32], strides = [1, 1]} : vector<6x32xf32> to vector<1x32xf32>
    %83 = vector.broadcast %82 : vector<1x32xf32> to vector<16x32xf32>
    %84 = arith.addf %81, %83 : vector<16x32xf32>
    %85 = arith.addf %31, %84 : vector<16x32xf32>
    %86 = vector.extract_strided_slice %34 {offsets = [1, 0], sizes = [1, 32], strides = [1, 1]} : vector<6x32xf32> to vector<1x32xf32>
    %87 = vector.extract_strided_slice %34 {offsets = [2, 0], sizes = [1, 32], strides = [1, 1]} : vector<6x32xf32> to vector<1x32xf32>
    %cst_41 = arith.constant dense<0.000000e+00> : vector<16xf32>
    %88 = vector.multi_reduction <add>, %85, %cst_41 [1] : vector<16x32xf32> to vector<16xf32>
    %89 = vector.shape_cast %88 : vector<16xf32> to vector<16x1xf32>
    %cst_42 = arith.constant 3.200000e+01 : f32
    %90 = vector.broadcast %cst_42 : f32 to vector<16x1xf32>
    %91 = arith.divf %89, %90 : vector<16x1xf32>
    %92 = vector.broadcast %91 : vector<16x1xf32> to vector<16x32xf32>
    %93 = arith.subf %85, %92 : vector<16x32xf32>
    %94 = arith.mulf %93, %93 : vector<16x32xf32>
    %cst_43 = arith.constant dense<0.000000e+00> : vector<16xf32>
    %95 = vector.multi_reduction <add>, %94, %cst_43 [1] : vector<16x32xf32> to vector<16xf32>
    %96 = vector.shape_cast %95 : vector<16xf32> to vector<16x1xf32>
    %cst_44 = arith.constant 3.200000e+01 : f32
    %97 = vector.broadcast %cst_44 : f32 to vector<16x1xf32>
    %98 = arith.divf %96, %97 : vector<16x1xf32>
    %cst_45 = arith.constant 9.99999996E-13 : f32
    %99 = vector.broadcast %cst_45 : f32 to vector<16x1xf32>
    %100 = arith.addf %98, %99 : vector<16x1xf32>
    %101 = math.rsqrt %100 : vector<16x1xf32>
    %102 = vector.broadcast %101 : vector<16x1xf32> to vector<16x32xf32>
    %103 = arith.mulf %93, %102 : vector<16x32xf32>
    %104 = vector.broadcast %86 : vector<1x32xf32> to vector<16x32xf32>
    %105 = arith.mulf %103, %104 : vector<16x32xf32>
    %106 = vector.broadcast %87 : vector<1x32xf32> to vector<16x32xf32>
    %107 = arith.addf %105, %106 : vector<16x32xf32>
    %c0_46 = arith.constant 0 : index
    %c0_47 = arith.constant 0 : index
    %c0_48 = arith.constant 0 : index
    %108 = vector.load %arg9[%c0_46, %c0_47, %c0_48] : memref<2x32x64xf32, #tpu.memory_space<vmem>>, vector<1x32x64xf32>
    %109 = vector.shape_cast %108 : vector<1x32x64xf32> to vector<32x64xf32>
    %cst_49 = arith.constant dense<0.000000e+00> : vector<16x64xf32>
    %110 = tpu.matmul %107, %109, %cst_49 {dimension_numbers = #tpu.dot_dimension_numbers<[1], [0], [0], [1], [0, 0, 1, 1], [], []>} : vector<16x32xf32>, vector<32x64xf32>, vector<16x64xf32> -> vector<16x64xf32>
    %c0_50 = arith.constant 0 : index
    %c0_51 = arith.constant 0 : index
    %c0_52 = arith.constant 0 : index
    %111 = vector.load %arg10[%c0_50, %c0_51, %c0_52] : memref<2x1x64xf32, #tpu.memory_space<vmem>>, vector<1x1x64xf32>
    %112 = vector.shape_cast %111 : vector<1x1x64xf32> to vector<1x64xf32>
    %113 = vector.broadcast %112 : vector<1x64xf32> to vector<16x64xf32>
    %114 = arith.addf %110, %113 : vector<16x64xf32>
    %cst_53 = arith.constant 5.000000e-01 : f32
    %115 = vector.broadcast %cst_53 : f32 to vector<16x64xf32>
    %116 = arith.mulf %115, %114 : vector<16x64xf32>
    %cst_54 = arith.constant 4.471500e-02 : f32
    %117 = vector.broadcast %cst_54 : f32 to vector<16x64xf32>
    %118 = arith.mulf %117, %114 : vector<16x64xf32>
    %119 = arith.mulf %118, %114 : vector<16x64xf32>
    %120 = arith.mulf %119, %114 : vector<16x64xf32>
    %121 = arith.addf %114, %120 : vector<16x64xf32>
    %cst_55 = arith.constant 0.797884583 : f32
    %122 = vector.broadcast %cst_55 : f32 to vector<16x64xf32>
    %123 = arith.mulf %122, %121 : vector<16x64xf32>
    %124 = math.tanh %123 : vector<16x64xf32>
    %cst_56 = arith.constant 1.000000e+00 : f32
    %125 = vector.broadcast %cst_56 : f32 to vector<16x64xf32>
    %126 = arith.addf %125, %124 : vector<16x64xf32>
    %127 = arith.mulf %116, %126 : vector<16x64xf32>
    %c0_57 = arith.constant 0 : index
    %c0_58 = arith.constant 0 : index
    %c0_59 = arith.constant 0 : index
    %128 = vector.load %arg11[%c0_57, %c0_58, %c0_59] : memref<2x64x32xf32, #tpu.memory_space<vmem>>, vector<1x64x32xf32>
    %129 = vector.shape_cast %128 : vector<1x64x32xf32> to vector<64x32xf32>
    %cst_60 = arith.constant dense<0.000000e+00> : vector<16x32xf32>
    %130 = tpu.matmul %127, %129, %cst_60 {dimension_numbers = #tpu.dot_dimension_numbers<[1], [0], [0], [1], [0, 0, 1, 1], [], []>} : vector<16x64xf32>, vector<64x32xf32>, vector<16x32xf32> -> vector<16x32xf32>
    %131 = vector.extract_strided_slice %34 {offsets = [3, 0], sizes = [1, 32], strides = [1, 1]} : vector<6x32xf32> to vector<1x32xf32>
    %132 = vector.broadcast %131 : vector<1x32xf32> to vector<16x32xf32>
    %133 = arith.addf %130, %132 : vector<16x32xf32>
    %134 = arith.addf %107, %133 : vector<16x32xf32>
    %135 = vector.extract_strided_slice %34 {offsets = [4, 0], sizes = [1, 32], strides = [1, 1]} : vector<6x32xf32> to vector<1x32xf32>
    %136 = vector.extract_strided_slice %34 {offsets = [5, 0], sizes = [1, 32], strides = [1, 1]} : vector<6x32xf32> to vector<1x32xf32>
    %cst_61 = arith.constant dense<0.000000e+00> : vector<16xf32>
    %137 = vector.multi_reduction <add>, %134, %cst_61 [1] : vector<16x32xf32> to vector<16xf32>
    %138 = vector.shape_cast %137 : vector<16xf32> to vector<16x1xf32>
    %cst_62 = arith.constant 3.200000e+01 : f32
    %139 = vector.broadcast %cst_62 : f32 to vector<16x1xf32>
    %140 = arith.divf %138, %139 : vector<16x1xf32>
    %141 = vector.broadcast %140 : vector<16x1xf32> to vector<16x32xf32>
    %142 = arith.subf %134, %141 : vector<16x32xf32>
    %143 = arith.mulf %142, %142 : vector<16x32xf32>
    %cst_63 = arith.constant dense<0.000000e+00> : vector<16xf32>
    %144 = vector.multi_reduction <add>, %143, %cst_63 [1] : vector<16x32xf32> to vector<16xf32>
    %145 = vector.shape_cast %144 : vector<16xf32> to vector<16x1xf32>
    %cst_64 = arith.constant 3.200000e+01 : f32
    %146 = vector.broadcast %cst_64 : f32 to vector<16x1xf32>
    %147 = arith.divf %145, %146 : vector<16x1xf32>
    %cst_65 = arith.constant 9.99999996E-13 : f32
    %148 = vector.broadcast %cst_65 : f32 to vector<16x1xf32>
    %149 = arith.addf %147, %148 : vector<16x1xf32>
    %150 = math.rsqrt %149 : vector<16x1xf32>
    %151 = vector.broadcast %150 : vector<16x1xf32> to vector<16x32xf32>
    %152 = arith.mulf %142, %151 : vector<16x32xf32>
    %153 = vector.broadcast %135 : vector<1x32xf32> to vector<16x32xf32>
    %154 = arith.mulf %152, %153 : vector<16x32xf32>
    %155 = vector.broadcast %136 : vector<1x32xf32> to vector<16x32xf32>
    %156 = arith.addf %154, %155 : vector<16x32xf32>
    %c1_66 = arith.constant 1 : index
    %c0_67 = arith.constant 0 : index
    %c0_68 = arith.constant 0 : index
    %157 = vector.load %arg12[%c1_66, %c0_67, %c0_68] : memref<2x6x32xf32, #tpu.memory_space<vmem>>, vector<1x6x32xf32>
    %158 = vector.shape_cast %157 : vector<1x6x32xf32> to vector<6x32xf32>
    %c1_69 = arith.constant 1 : index
    %c0_70 = arith.constant 0 : index
    %c0_71 = arith.constant 0 : index
    %159 = vector.load %arg6[%c1_69, %c0_70, %c0_71] : memref<2x32x96xf32, #tpu.memory_space<vmem>>, vector<1x32x96xf32>
    %160 = vector.shape_cast %159 : vector<1x32x96xf32> to vector<32x96xf32>
    %cst_72 = arith.constant dense<0.000000e+00> : vector<16x96xf32>
    %161 = tpu.matmul %156, %160, %cst_72 {dimension_numbers = #tpu.dot_dimension_numbers<[1], [0], [0], [1], [0, 0, 1, 1], [], []>} : vector<16x32xf32>, vector<32x96xf32>, vector<16x96xf32> -> vector<16x96xf32>
    %c1_73 = arith.constant 1 : index
    %c0_74 = arith.constant 0 : index
    %c0_75 = arith.constant 0 : index
    %162 = vector.load %arg7[%c1_73, %c0_74, %c0_75] : memref<2x1x96xf32, #tpu.memory_space<vmem>>, vector<1x1x96xf32>
    %163 = vector.shape_cast %162 : vector<1x1x96xf32> to vector<1x96xf32>
    %164 = vector.broadcast %163 : vector<1x96xf32> to vector<16x96xf32>
    %165 = arith.addf %161, %164 : vector<16x96xf32>
    %166 = vector.extract_strided_slice %165 {offsets = [0, 0], sizes = [16, 16], strides = [1, 1]} : vector<16x96xf32> to vector<16x16xf32>
    %167 = vector.extract_strided_slice %165 {offsets = [0, 32], sizes = [16, 16], strides = [1, 1]} : vector<16x96xf32> to vector<16x16xf32>
    %168 = vector.extract_strided_slice %165 {offsets = [0, 64], sizes = [16, 16], strides = [1, 1]} : vector<16x96xf32> to vector<16x16xf32>
    %cst_76 = arith.constant dense<0.000000e+00> : vector<16x16xf32>
    %169 = tpu.matmul %166, %167, %cst_76 {dimension_numbers = #tpu.dot_dimension_numbers<[1], [1], [0], [0], [0, 0, 1, 0], [], []>} : vector<16x16xf32>, vector<16x16xf32>, vector<16x16xf32> -> vector<16x16xf32>
    %cst_77 = arith.constant 0.000000e+00 : f32
    %170 = vector.broadcast %cst_77 : f32 to vector<16x16xf32>
    %171 = arith.cmpf ogt, %32, %170 : vector<16x16xf32>
    %cst_78 = arith.constant -3.40282347E+38 : f32
    %172 = vector.broadcast %cst_78 : f32 to vector<16x16xf32>
    %173 = arith.select %171, %169, %172 : vector<16x16xi1>, vector<16x16xf32>
    %cst_79 = arith.constant dense<0xFF800000> : vector<16xf32>
    %174 = vector.multi_reduction <maximumf>, %173, %cst_79 [1] : vector<16x16xf32> to vector<16xf32>
    %175 = vector.shape_cast %174 : vector<16xf32> to vector<16x1xf32>
    %176 = vector.broadcast %175 : vector<16x1xf32> to vector<16x16xf32>
    %177 = arith.subf %173, %176 : vector<16x16xf32>
    %178 = math.exp %177 : vector<16x16xf32>
    %cst_80 = arith.constant dense<0.000000e+00> : vector<16xf32>
    %179 = vector.multi_reduction <add>, %178, %cst_80 [1] : vector<16x16xf32> to vector<16xf32>
    %180 = vector.shape_cast %179 : vector<16xf32> to vector<16x1xf32>
    %181 = vector.broadcast %180 : vector<16x1xf32> to vector<16x16xf32>
    %182 = arith.divf %178, %181 : vector<16x16xf32>
    %cst_81 = arith.constant dense<0.000000e+00> : vector<16x16xf32>
    %183 = tpu.matmul %182, %168, %cst_81 {dimension_numbers = #tpu.dot_dimension_numbers<[1], [0], [0], [1], [0, 0, 1, 1], [], []>} : vector<16x16xf32>, vector<16x16xf32>, vector<16x16xf32> -> vector<16x16xf32>
    %184 = vector.extract_strided_slice %165 {offsets = [0, 16], sizes = [16, 16], strides = [1, 1]} : vector<16x96xf32> to vector<16x16xf32>
    %185 = vector.extract_strided_slice %165 {offsets = [0, 48], sizes = [16, 16], strides = [1, 1]} : vector<16x96xf32> to vector<16x16xf32>
    %186 = vector.extract_strided_slice %165 {offsets = [0, 80], sizes = [16, 16], strides = [1, 1]} : vector<16x96xf32> to vector<16x16xf32>
    %cst_82 = arith.constant dense<0.000000e+00> : vector<16x16xf32>
    %187 = tpu.matmul %184, %185, %cst_82 {dimension_numbers = #tpu.dot_dimension_numbers<[1], [1], [0], [0], [0, 0, 1, 0], [], []>} : vector<16x16xf32>, vector<16x16xf32>, vector<16x16xf32> -> vector<16x16xf32>
    %cst_83 = arith.constant 0.000000e+00 : f32
    %188 = vector.broadcast %cst_83 : f32 to vector<16x16xf32>
    %189 = arith.cmpf ogt, %32, %188 : vector<16x16xf32>
    %cst_84 = arith.constant -3.40282347E+38 : f32
    %190 = vector.broadcast %cst_84 : f32 to vector<16x16xf32>
    %191 = arith.select %189, %187, %190 : vector<16x16xi1>, vector<16x16xf32>
    %cst_85 = arith.constant dense<0xFF800000> : vector<16xf32>
    %192 = vector.multi_reduction <maximumf>, %191, %cst_85 [1] : vector<16x16xf32> to vector<16xf32>
    %193 = vector.shape_cast %192 : vector<16xf32> to vector<16x1xf32>
    %194 = vector.broadcast %193 : vector<16x1xf32> to vector<16x16xf32>
    %195 = arith.subf %191, %194 : vector<16x16xf32>
    %196 = math.exp %195 : vector<16x16xf32>
    %cst_86 = arith.constant dense<0.000000e+00> : vector<16xf32>
    %197 = vector.multi_reduction <add>, %196, %cst_86 [1] : vector<16x16xf32> to vector<16xf32>
    %198 = vector.shape_cast %197 : vector<16xf32> to vector<16x1xf32>
    %199 = vector.broadcast %198 : vector<16x1xf32> to vector<16x16xf32>
    %200 = arith.divf %196, %199 : vector<16x16xf32>
    %cst_87 = arith.constant dense<0.000000e+00> : vector<16x16xf32>
    %201 = tpu.matmul %200, %186, %cst_87 {dimension_numbers = #tpu.dot_dimension_numbers<[1], [0], [0], [1], [0, 0, 1, 1], [], []>} : vector<16x16xf32>, vector<16x16xf32>, vector<16x16xf32> -> vector<16x16xf32>
    %202 = tpu.concatenate %183, %201 in 1 : vector<16x16xf32>, vector<16x16xf32> -> vector<16x32xf32>
    %c1_88 = arith.constant 1 : index
    %c0_89 = arith.constant 0 : index
    %c0_90 = arith.constant 0 : index
    %203 = vector.load %arg8[%c1_88, %c0_89, %c0_90] : memref<2x32x32xf32, #tpu.memory_space<vmem>>, vector<1x32x32xf32>
    %204 = vector.shape_cast %203 : vector<1x32x32xf32> to vector<32x32xf32>
    %cst_91 = arith.constant dense<0.000000e+00> : vector<16x32xf32>
    %205 = tpu.matmul %202, %204, %cst_91 {dimension_numbers = #tpu.dot_dimension_numbers<[1], [0], [0], [1], [0, 0, 1, 1], [], []>} : vector<16x32xf32>, vector<32x32xf32>, vector<16x32xf32> -> vector<16x32xf32>
    %206 = vector.extract_strided_slice %158 {offsets = [0, 0], sizes = [1, 32], strides = [1, 1]} : vector<6x32xf32> to vector<1x32xf32>
    %207 = vector.broadcast %206 : vector<1x32xf32> to vector<16x32xf32>
    %208 = arith.addf %205, %207 : vector<16x32xf32>
    %209 = arith.addf %156, %208 : vector<16x32xf32>
    %210 = vector.extract_strided_slice %158 {offsets = [1, 0], sizes = [1, 32], strides = [1, 1]} : vector<6x32xf32> to vector<1x32xf32>
    %211 = vector.extract_strided_slice %158 {offsets = [2, 0], sizes = [1, 32], strides = [1, 1]} : vector<6x32xf32> to vector<1x32xf32>
    %cst_92 = arith.constant dense<0.000000e+00> : vector<16xf32>
    %212 = vector.multi_reduction <add>, %209, %cst_92 [1] : vector<16x32xf32> to vector<16xf32>
    %213 = vector.shape_cast %212 : vector<16xf32> to vector<16x1xf32>
    %cst_93 = arith.constant 3.200000e+01 : f32
    %214 = vector.broadcast %cst_93 : f32 to vector<16x1xf32>
    %215 = arith.divf %213, %214 : vector<16x1xf32>
    %216 = vector.broadcast %215 : vector<16x1xf32> to vector<16x32xf32>
    %217 = arith.subf %209, %216 : vector<16x32xf32>
    %218 = arith.mulf %217, %217 : vector<16x32xf32>
    %cst_94 = arith.constant dense<0.000000e+00> : vector<16xf32>
    %219 = vector.multi_reduction <add>, %218, %cst_94 [1] : vector<16x32xf32> to vector<16xf32>
    %220 = vector.shape_cast %219 : vector<16xf32> to vector<16x1xf32>
    %cst_95 = arith.constant 3.200000e+01 : f32
    %221 = vector.broadcast %cst_95 : f32 to vector<16x1xf32>
    %222 = arith.divf %220, %221 : vector<16x1xf32>
    %cst_96 = arith.constant 9.99999996E-13 : f32
    %223 = vector.broadcast %cst_96 : f32 to vector<16x1xf32>
    %224 = arith.addf %222, %223 : vector<16x1xf32>
    %225 = math.rsqrt %224 : vector<16x1xf32>
    %226 = vector.broadcast %225 : vector<16x1xf32> to vector<16x32xf32>
    %227 = arith.mulf %217, %226 : vector<16x32xf32>
    %228 = vector.broadcast %210 : vector<1x32xf32> to vector<16x32xf32>
    %229 = arith.mulf %227, %228 : vector<16x32xf32>
    %230 = vector.broadcast %211 : vector<1x32xf32> to vector<16x32xf32>
    %231 = arith.addf %229, %230 : vector<16x32xf32>
    %c1_97 = arith.constant 1 : index
    %c0_98 = arith.constant 0 : index
    %c0_99 = arith.constant 0 : index
    %232 = vector.load %arg9[%c1_97, %c0_98, %c0_99] : memref<2x32x64xf32, #tpu.memory_space<vmem>>, vector<1x32x64xf32>
    %233 = vector.shape_cast %232 : vector<1x32x64xf32> to vector<32x64xf32>
    %cst_100 = arith.constant dense<0.000000e+00> : vector<16x64xf32>
    %234 = tpu.matmul %231, %233, %cst_100 {dimension_numbers = #tpu.dot_dimension_numbers<[1], [0], [0], [1], [0, 0, 1, 1], [], []>} : vector<16x32xf32>, vector<32x64xf32>, vector<16x64xf32> -> vector<16x64xf32>
    %c1_101 = arith.constant 1 : index
    %c0_102 = arith.constant 0 : index
    %c0_103 = arith.constant 0 : index
    %235 = vector.load %arg10[%c1_101, %c0_102, %c0_103] : memref<2x1x64xf32, #tpu.memory_space<vmem>>, vector<1x1x64xf32>
    %236 = vector.shape_cast %235 : vector<1x1x64xf32> to vector<1x64xf32>
    %237 = vector.broadcast %236 : vector<1x64xf32> to vector<16x64xf32>
    %238 = arith.addf %234, %237 : vector<16x64xf32>
    %cst_104 = arith.constant 5.000000e-01 : f32
    %239 = vector.broadcast %cst_104 : f32 to vector<16x64xf32>
    %240 = arith.mulf %239, %238 : vector<16x64xf32>
    %cst_105 = arith.constant 4.471500e-02 : f32
    %241 = vector.broadcast %cst_105 : f32 to vector<16x64xf32>
    %242 = arith.mulf %241, %238 : vector<16x64xf32>
    %243 = arith.mulf %242, %238 : vector<16x64xf32>
    %244 = arith.mulf %243, %238 : vector<16x64xf32>
    %245 = arith.addf %238, %244 : vector<16x64xf32>
    %cst_106 = arith.constant 0.797884583 : f32
    %246 = vector.broadcast %cst_106 : f32 to vector<16x64xf32>
    %247 = arith.mulf %246, %245 : vector<16x64xf32>
    %248 = math.tanh %247 : vector<16x64xf32>
    %cst_107 = arith.constant 1.000000e+00 : f32
    %249 = vector.broadcast %cst_107 : f32 to vector<16x64xf32>
    %250 = arith.addf %249, %248 : vector<16x64xf32>
    %251 = arith.mulf %240, %250 : vector<16x64xf32>
    %c1_108 = arith.constant 1 : index
    %c0_109 = arith.constant 0 : index
    %c0_110 = arith.constant 0 : index
    %252 = vector.load %arg11[%c1_108, %c0_109, %c0_110] : memref<2x64x32xf32, #tpu.memory_space<vmem>>, vector<1x64x32xf32>
    %253 = vector.shape_cast %252 : vector<1x64x32xf32> to vector<64x32xf32>
    %cst_111 = arith.constant dense<0.000000e+00> : vector<16x32xf32>
    %254 = tpu.matmul %251, %253, %cst_111 {dimension_numbers = #tpu.dot_dimension_numbers<[1], [0], [0], [1], [0, 0, 1, 1], [], []>} : vector<16x64xf32>, vector<64x32xf32>, vector<16x32xf32> -> vector<16x32xf32>
    %255 = vector.extract_strided_slice %158 {offsets = [3, 0], sizes = [1, 32], strides = [1, 1]} : vector<6x32xf32> to vector<1x32xf32>
    %256 = vector.broadcast %255 : vector<1x32xf32> to vector<16x32xf32>
    %257 = arith.addf %254, %256 : vector<16x32xf32>
    %258 = arith.addf %231, %257 : vector<16x32xf32>
    %259 = vector.extract_strided_slice %158 {offsets = [4, 0], sizes = [1, 32], strides = [1, 1]} : vector<6x32xf32> to vector<1x32xf32>
    %260 = vector.extract_strided_slice %158 {offsets = [5, 0], sizes = [1, 32], strides = [1, 1]} : vector<6x32xf32> to vector<1x32xf32>
    %cst_112 = arith.constant dense<0.000000e+00> : vector<16xf32>
    %261 = vector.multi_reduction <add>, %258, %cst_112 [1] : vector<16x32xf32> to vector<16xf32>
    %262 = vector.shape_cast %261 : vector<16xf32> to vector<16x1xf32>
    %cst_113 = arith.constant 3.200000e+01 : f32
    %263 = vector.broadcast %cst_113 : f32 to vector<16x1xf32>
    %264 = arith.divf %262, %263 : vector<16x1xf32>
    %265 = vector.broadcast %264 : vector<16x1xf32> to vector<16x32xf32>
    %266 = arith.subf %258, %265 : vector<16x32xf32>
    %267 = arith.mulf %266, %266 : vector<16x32xf32>
    %cst_114 = arith.constant dense<0.000000e+00> : vector<16xf32>
    %268 = vector.multi_reduction <add>, %267, %cst_114 [1] : vector<16x32xf32> to vector<16xf32>
    %269 = vector.shape_cast %268 : vector<16xf32> to vector<16x1xf32>
    %cst_115 = arith.constant 3.200000e+01 : f32
    %270 = vector.broadcast %cst_115 : f32 to vector<16x1xf32>
    %271 = arith.divf %269, %270 : vector<16x1xf32>
    %cst_116 = arith.constant 9.99999996E-13 : f32
    %272 = vector.broadcast %cst_116 : f32 to vector<16x1xf32>
    %273 = arith.addf %271, %272 : vector<16x1xf32>
    %274 = math.rsqrt %273 : vector<16x1xf32>
    %275 = vector.broadcast %274 : vector<16x1xf32> to vector<16x32xf32>
    %276 = arith.mulf %266, %275 : vector<16x32xf32>
    %277 = vector.broadcast %259 : vector<1x32xf32> to vector<16x32xf32>
    %278 = arith.mulf %276, %277 : vector<16x32xf32>
    %279 = vector.broadcast %260 : vector<1x32xf32> to vector<16x32xf32>
    %280 = arith.addf %278, %279 : vector<16x32xf32>
    %c0_117 = arith.constant 0 : index
    %c0_118 = arith.constant 0 : index
    %281 = vector.load %arg2[%c0_117, %c0_118] : memref<2x16xf32, #tpu.memory_space<vmem>>, vector<2x16xf32>
    %cst_119 = arith.constant dense<0.000000e+00> : vector<2x32xf32>
    %282 = tpu.matmul %281, %280, %cst_119 {dimension_numbers = #tpu.dot_dimension_numbers<[1], [0], [0], [1], [0, 0, 1, 1], [], []>} : vector<2x16xf32>, vector<16x32xf32>, vector<2x32xf32> -> vector<2x32xf32>
    %c0_120 = arith.constant 0 : index
    %c0_121 = arith.constant 0 : index
    %283 = vector.load %arg13[%c0_120, %c0_121] : memref<32x2xf32, #tpu.memory_space<vmem>>, vector<32x2xf32>
    %cst_122 = arith.constant dense<0.000000e+00> : vector<2x2xf32>
    %284 = tpu.matmul %282, %283, %cst_122 {dimension_numbers = #tpu.dot_dimension_numbers<[1], [0], [0], [1], [0, 0, 1, 1], [], []>} : vector<2x32xf32>, vector<32x2xf32>, vector<2x2xf32> -> vector<2x2xf32>
    %c0_123 = arith.constant 0 : index
    %c0_124 = arith.constant 0 : index
    %285 = vector.load %arg14[%c0_123, %c0_124] : memref<1x2xf32, #tpu.memory_space<vmem>>, vector<1x2xf32>
    %286 = vector.broadcast %285 : vector<1x2xf32> to vector<2x2xf32>
    %287 = arith.addf %284, %286 : vector<2x2xf32>
    %c0_125 = arith.constant 0 : index
    %c0_126 = arith.constant 0 : index
    %288 = vector.load %arg15[%c0_125, %c0_126] : memref<2x2xf32, #tpu.memory_space<vmem>>, vector<2x2xf32>
    tpu.vector_store %arg15[%c0_125, %c0_126], %287 {strides = array<i32>} : memref<2x2xf32, #tpu.memory_space<vmem>>, vector<2x2xf32>,
    return
  }
}

</mosaic_0001>

<bundles_post_ra>
// kernel: distilbert_cls_forward.1
= control target key start
LH: loop header
LB: loop body
LE: loop exit
PB: predicated region body
PF: predicated region fallthrough
CT: control target
= control target key end

     0   :  { %v2799_v2 = vmov 0   ;;  %s3321_s0 = inlined_call_operand.vmem [shape: s32[16,1], index: 0, kind: input, shape index: {}]   ;;  %s3322_s1 = inlined_call_operand.vmem [shape: f32[16,16], index: 1, kind: input, shape index: {}]   ;;  %s3323_s2 = inlined_call_operand.vmem [shape: f32[2,16], index: 2, kind: input, shape index: {}]   ;;  %s3324_s3 = inlined_call_operand.vmem [shape: f32[50,32], index: 3, kind: input, shape index: {}]   ;;  %s3325_s4 = inlined_call_operand.vmem [shape: f32[16,32], index: 4, kind: input, shape index: {}]   ;;  %s3326_s5 = inlined_call_operand.vmem [shape: f32[2,32], index: 5, kind: input, shape index: {}]   ;;  %s3327_s6 = inlined_call_operand.vmem [shape: f32[2,32,96], index: 6, kind: input, shape index: {}]   ;;  %s3328_s7 = inlined_call_operand.vmem [shape: f32[2,1,96], index: 7, kind: input, shape index: {}]   ;;  %s3329_s8 = inlined_call_operand.vmem [shape: f32[2,32,32], index: 8, kind: input, shape index: {}]   ;;  %s3330_s9 = inlined_call_operand.vmem [shape: f32[2,32,64], index: 9, kind: input, shape index: {}]   ;;  %s3331_s10 = inlined_call_operand.vmem [shape: f32[2,1,64], index: 10, kind: input, shape index: {}]   ;;  %s3332_s11 = inlined_call_operand.vmem [shape: f32[2,64,32], index: 11, kind: input, shape index: {}]   ;;  %s3333_s12 = inlined_call_operand.vmem [shape: f32[2,6,32], index: 12, kind: input, shape index: {}]   ;;  %s3334_s13 = inlined_call_operand.vmem [shape: f32[32,2], index: 13, kind: input, shape index: {}]   ;;  %s3335_s14 = inlined_call_operand.vmem [shape: f32[1,2], index: 14, kind: input, shape index: {}]   ;;  %s3336_s15 = inlined_call_operand.hbm [shape: f32[2,2], index: 15, kind: output, shape index: {}]  }
   0x1   :  { %v51_v0 = vld [vmem:[%s3321_s0] sm:$0xff]  ;;  %2674 = vset.pattern.permute.xlu0 %v2799_v2  ;;  %v68_v3 = vld [vmem:[%s3324_s3 + $0x8] sm:$0xff]  ;;  %v69_v4 = vld [vmem:[%s3324_s3 + $0x10] sm:$0xff] }
   0x2   :  { %v67_v1 = vld [vmem:[%s3324_s3] sm:$0xff]  ;;  %v70_v5 = vld [vmem:[%s3324_s3 + $0x18] sm:$0xff]  ;;  %56 = vperm.xlu0 %2674, %v51_v0  }
   0x3   :  { %v2522_v6 = vpack.c.bf16 %v68_v3, %v67_v1  ;;  %v2526_v7 = vpack.c.bf16 %v70_v5, %v69_v4 }
   0x4   :  { %20 = vsyncpa [#allocation3], 0  ;;  %v52_v8 = vld [vmem:[%s3321_s0 + $0x8] sm:$0xff]  ;;  %v71_v9 = vld [vmem:[%s3324_s3 + $0x20] sm:$0xff]  ;;  %vm83_vm0 = vcmask 1041408   ;;  %v53_v13 = vlaneseq  ;;  %vm76_vm1 = vcmask 408576  }
   0x5   :  { %v72_v10 = vld [vmem:[%s3324_s3 + $0x28] sm:$0xff]  ;;  %2523 = vmatprep.subr.bf16.mxu0 %v2522_v6  ;;  %v73_v12 = vld [vmem:[%s3324_s3 + $0x30] sm:$0x3]  ;;  %v2800_v16 = vmov 0.0   ;;  %v74_v20 = vld [vmem:[%s3325_s4] sm:$0xff]  ;;  %vm164_vm4 = vcmask 261120  }
   0x6   :  { %2525 = vmatpush3.bf16.msra.mxu0 %v2522_v6  ;;  %59 = vperm.xlu0 %2674, %v52_v8   ;;  %v2530_v11 = vpack.c.bf16 %v72_v10, %v71_v9  ;;  %v54_v14 = vand.u32 127, %v53_v13  ;;  %v75_v22 = vld [vmem:[%s3325_s4 + $0x8] sm:$0xff]  ;;  %v207_v38 = vld [vmem:[%s3327_s6] sm:$0xff]  ;;  %v209_v40 = vld [vmem:[%s3327_s6 + $0x10] sm:$0xff]  ;;  %vm305_vm5 = vcmask 130048   ;;  %s2802_s0 = smov 80  }
   0x7   :  { %2527 = vmatprep.subr.bf16.mxu0 %v2526_v7  ;;  %v208_v39 = vld [vmem:[%s3327_s6 + $0x8] sm:$0xff]  ;;  %v210_v42 = vld [vmem:[%s3327_s6 + $0x18] sm:$0xff]  ;;  %v2150_v51 = vld [vmem:[%s3326_s5] ss:$0 sm:$0xff]  ;;  %s2803_s3 = smov 112   ;;  %s2805_s24 = smov 64  }
   0x8   :  { %v2534_v41 = vpack.c.bf16 %v208_v39, %v207_v38  ;;  %v2538_v43 = vpack.c.bf16 %v210_v42, %v209_v40  ;;  %v2151_v53 = vld [vmem:[%s3326_s5 + $0x1] ss:$0 sm:$0xff]  ;;  %v2152_v60 = vld [vmem:[%s3328_s7] ss:$0 sm:$0xff]  ;;  %s2801_s5 = smov 96   ;;  %vm2970_vm6 = vmpackc.low %vm305_vm5, %vm305_vm5  ;;  %s2806_s18 = smov 16  }
   0x9   :  { %vm965_vm9 = vcmask 523264   ;;  %vm2808_vm10 = vmmov 0   ;;  %s2809_s23 = smov [#allocation2]   ;;  %vm2129_vm11 = vcmask 9216  }
   0xa   :  { %2529 = vmatpush3.bf16.msra.mxu0 %v2526_v7  ;;  %2535 = vmatprep.subr.bf16.mxu1 %v2534_v41  ;;  %s2137_s25 = sshll.u32 %s2809_s23, 4  ;;  %s2138_s25 = int_to_ptr.vmem [resolvable:$true] %s2137_s25 }
   0xb   :  { %2531 = vmatprep.subr.bf16.mxu0 %v2530_v11  ;;  %2537 = vmatpush3.bf16.msra.mxu1 %v2534_v41  ;;  %p2780_p1 = scmp.lt.s32.totalorder %s2138_s25, %s2138_s25 }
   0xc   :  { %2539 = vmatprep.subr.bf16.mxu1 %v2538_v43 }
   0xe   :  { %2533 = vmatpush3.bf16.msra.mxu0 %v2530_v11 }
   0xf   :  { %2339 = vmatprep.subr.msk.mxu0 %vm83_vm0, %v73_v12  ;;  %2541 = vmatpush3.bf16.msra.mxu1 %v2538_v43 }
  0x12   :  { %2340 = vmatpush3.msk.msra.mxu0 %vm83_vm0, %v73_v12 }
  0x81   :  { %v57_v15 = vpop.permute.xlu0 %56 }
  0x82   :  { %vm61_vm2 = vcmp.eq.s32.totalorder %v57_v15, %v54_v14  ;;  %v2993_v15 = vld [vmem:[%s3322_s1] sm:$0xff] }
  0x83   :  { %v2145_v17 = vsel %vm61_vm2, 1.0, %v2800_v16  ;;  %vm389_vm8 = vcmp.gt.f32.partialorder %v2993_v15, 0.0 }
  0x84   :  { %2341 = vmatprep.mubr.msk.f32.mxu0 %vm76_vm1, %v2145_v17 }
  0x85   :  { %v60_v18 = vpop.permute.xlu0 %59 }
  0x86   :  { %vm62_vm3 = vcmp.eq.s32.totalorder %v60_v18, %v54_v14  ;;  %v2988_v14 = vld [vmem:[%s3322_s1 + $0x8] sm:$0xff]  ;;  %s2804_s1 = smov 48  }
  0x87   :  { %v2146_v19 = vsel %vm62_vm3, 1.0, %v2800_v16  ;;  %vm390_vm7 = vcmp.gt.f32.partialorder %v2988_v14, 0.0 }
  0x88   :  { %2342 = vmatmul.mubr.msk.f32.vlgmr.msra.gmra.mrb[0].mxu0 %vm76_vm1, %v2146_v19 }
 0x15b   :  { %v2343_v21 = vpop.f32.mrb[0].mxu0 }
 0x15c   :  { %v153_v23 = vpop.f32.mrb[1].mxu0  ;;  %v159_v25 = vadd.f32 %v2343_v21, %v75_v22 }
 0x15d   :  { %v154_v24 = vadd.f32 %v153_v23, %v74_v20 }
 0x15e   :  { %v168_v27 = vsel %vm164_vm4, %v159_v25, 0.0 }
 0x15f   :  { %v165_v26 = vsel %vm164_vm4, %v154_v24, 0.0 }
 0x160   :  { %166 = vadd.xlane.f32.xlu1 %v165_v26 }
 0x164   :  { %169 = vadd.xlane.f32.xlu1 %v168_v27 }
 0x1ed   :  { %v167_v28 = vpop.xlane.xlu1 %166 }
 0x1ee   :  { %v172_v29 = vmul.f32 0.03125, %v167_v28 }
 0x1f0   :  { %v174_v30 = vsub.f32 %v154_v24, %v172_v29 }
 0x1f1   :  { %v170_v31 = vpop.xlane.xlu1 %169 }
 0x1f2   :  { %v173_v32 = vmul.f32 0.03125, %v170_v31  ;;  %v176_v33 = vmul.f32 %v174_v30, %v174_v30 }
 0x1f4   :  { %v175_v34 = vsub.f32 %v159_v25, %v173_v32  ;;  %v178_v35 = vsel %vm164_vm4, %v176_v33, 0.0 }
 0x1f5   :  { %179 = vadd.xlane.f32.xlu0 %v178_v35 }
 0x1f6   :  { %v177_v36 = vmul.f32 %v175_v34, %v175_v34 }
 0x1f8   :  { %v181_v37 = vsel %vm164_vm4, %v177_v36, 0.0 }
 0x1f9   :  { %182 = vadd.xlane.f32.xlu1 %v181_v37 }
 0x282   :  { %v180_v44 = vpop.xlane.xlu0 %179 }
 0x283   :  { %v184_v45 = vmul.f32 0.03125, %v180_v44 }
 0x285   :  { %v186_v46 = vadd.f32 1e-12, %v184_v45 }
 0x286   :  { %v183_v47 = vpop.xlane.xlu1 %182 }
 0x287   :  { %2715 = vrsqrt.f32 %v186_v46  ;;  %v185_v48 = vmul.f32 0.03125, %v183_v47 }
 0x289   :  { %v187_v49 = vadd.f32 1e-12, %v185_v48 }
 0x28b   :  { %2717 = vrsqrt.f32 %v187_v49 }
 0x291   :  { %v2716_v50 = vpop.eup %2715 }
 0x292   :  { %v190_v52 = vmul.f32 %v2716_v50, %v174_v30 }
 0x294   :  { %v196_v54 = vmul.f32 %v2150_v51, %v190_v52 }
 0x295   :  { %v2718_v55 = vpop.eup %2717 }
 0x296   :  { %v191_v56 = vmul.f32 %v2718_v55, %v175_v34  ;;  %v2948_v57 = vadd.f32 %v2151_v53, %v196_v54 }
 0x298   :  { %v197_v58 = vmul.f32 %v2150_v51, %v191_v56  ;;  %2352 = vmatprep.mubr.msk.f32.mxu1 %vm164_vm4, %v2948_v57 }
 0x29a   :  { %v2952_v59 = vadd.f32 %v2151_v53, %v197_v58 }
 0x29c   :  { %2353 = vmatmul.mubr.msk.f32.vlgmr.msra.gmra.mrb[0].mxu1 %vm164_vm4, %v2952_v59 }
 0x36f   :  { %v2354_v61 = vpop.f32.mrb[0].mxu1 }
 0x370   :  { %v296_v62 = vadd.f32 %v2354_v61, %v2152_v60  ;;  %v290_v63 = vpop.f32.mrb[1].mxu1 }
 0x371   :  { %v291_v0 = vadd.f32 %v2152_v60, %v290_v63 }
 0x373   :  { %2359 = vmatprep.mubr.msk.f32.mxu1 %vm305_vm5, %v291_v0  ;;  %v2960_v1 = vpack.i.bf16 %v296_v62, %v291_v0 }
 0x375   :  { %2676 = vrot.lane.b32.xlu1 %v2960_v1, %s2801_s5 }
 0x379   :  { %2681 = vrot.lane.b32.xlu1 %v2960_v1, %s2802_s0 }
 0x37d   :  { %502 = vrot.lane.b32.xlu1 %v291_v0, %s2803_s3 }
 0x381   :  { %504 = vrot.lane.b32.xlu1 %v296_v62, %s2803_s3 }
 0x3e7   :  { %v2677_v2 = vpop.permute.xlu1 %2676 }
 0x3e8   :  { %v2679_v3 = vunpack.i.h.bf16 %v2677_v2  ;;  %v2678_v4 = vunpack.i.l.bf16 %v2677_v2 }
 0x3ea   :  { %v2542_v6 = vpack.c.bf16 %v2679_v3, %v2678_v4 }
 0x3eb   :  { %v2682_v7 = vpop.permute.xlu1 %2681 }
 0x3ec   :  { %v2684_v8 = vunpack.i.h.bf16 %v2682_v7  ;;  %v2683_v9 = vunpack.i.l.bf16 %v2682_v7  ;;  %2544 = vmatprep.subr.msk.bf16.mxu1 %vm2970_vm6, %v2542_v6 }
 0x3ed   :  { %2547 = vmatpush3.bf16.xpose.msk.msra.mxu1 %vm2970_vm6, %v2542_v6 }
 0x3ee   :  { %v2552_v10 = vpack.c.bf16 %v2684_v8, %v2683_v9  ;;  %v714_v8 = vld [vmem:[%s3329_s8] sm:$0xff]  ;;  %v715_v9 = vld [vmem:[%s3329_s8 + $0x8] sm:$0xff] }
 0x3ef   :  { %v503_v11 = vpop.permute.xlu1 %502 }
 0x3f0   :  { %2554 = vmatprep.subr.msk.bf16.mxu1 %vm2970_vm6, %v2552_v10 }
 0x3f3   :  { %v505_v12 = vpop.permute.xlu1 %504 }
 0x3f4   :  { %2360 = vmatmul.mubr.msk.f32.vlgmr.msra.gmra.mrb[2].mxu1 %vm305_vm5, %v296_v62 }
 0x3f5   :  { %2557 = vmatpush3.bf16.xpose.msk.msra.mxu1 %vm2970_vm6, %v2552_v10  ;;  %2373 = vmatprep.mubr.msk.f32.mxu1 %vm305_vm5, %v503_v11  ;;  %v2562_v10 = vpack.c.bf16 %v715_v9, %v714_v8  ;;  %v716_v11 = vld [vmem:[%s3329_s8 + $0x10] sm:$0xff]  ;;  %v953_v8 = vld [vmem:[%s3332_s11] sm:$0xff]  ;;  %v954_v9 = vld [vmem:[%s3332_s11 + $0x8] sm:$0xff] }
 0x3fc   :  { %2374 = vmatmul.mubr.msk.f32.vlgmr.msra.gmra.mrb[4].mxu1 %vm305_vm5, %v505_v12  ;;  %v717_v12 = vld [vmem:[%s3329_s8 + $0x18] sm:$0xff] }
 0x4c7   :  { %v2361_v17 = vpop.f32.mrb[2].mxu1 }
 0x4c8   :  { %v392_v18 = vsel %vm390_vm7, %v2361_v17, -3.4028235e+38  ;;  %v380_v19 = vpop.f32.mrb[3].mxu1  ;;  %v2566_v17 = vpack.c.bf16 %v717_v12, %v716_v11  ;;  %v955_v11 = vld [vmem:[%s3332_s11 + $0x10] sm:$0xff]  ;;  %v956_v12 = vld [vmem:[%s3332_s11 + $0x18] sm:$0xff] }
 0x4c9   :  { %v391_v20 = vsel %vm389_vm8, %v380_v19, -3.4028235e+38  ;;  %v396_v21 = vsel %vm305_vm5, %v392_v18, -inf }
 0x4ca   :  { %397 = vmax.xlane.f32.xlu1 %v396_v21  ;;  %v393_v22 = vsel %vm305_vm5, %v391_v20, -inf }
 0x4cb   :  { %394 = vmax.xlane.f32.xlu0 %v393_v22 }
 0x4cf   :  { %v2375_v23 = vpop.f32.mrb[4].mxu1 }
 0x4d0   :  { %v584_v24 = vpop.f32.mrb[5].mxu1  ;;  %v594_v27 = vsel %vm390_vm7, %v2375_v23, -3.4028235e+38 }
 0x4d1   :  { %v593_v25 = vsel %vm389_vm8, %v584_v24, -3.4028235e+38  ;;  %v598_v28 = vsel %vm305_vm5, %v594_v27, -inf }
 0x4d2   :  { %v595_v26 = vsel %vm305_vm5, %v593_v25, -inf }
 0x4d3   :  { %596 = vmax.xlane.f32.xlu0 %v595_v26  ;;  %v3040_v26 = vshrl.u32 %v53_v13, 7 }
 0x4d7   :  { %599 = vmax.xlane.f32.xlu0 %v598_v28  ;;  %v3046_v28 = vld [vmem:[%s3333_s12] sm:$0x3f] }
 0x4db   :  { %2691 = vrot.lane.b32.xlu1 %v2960_v1, %s2804_s1 }
 0x557   :  { %v398_v29 = vpop.xlane.xlu1 %397 }
 0x558   :  { %v400_v30 = vsub.f32 %v392_v18, %v398_v29  ;;  %v395_v31 = vpop.xlane.xlu0 %394 }
 0x559   :  { %v399_v32 = vsub.f32 %v391_v20, %v395_v31 }
 0x55a   :  { %v403_v33 = vmul.f32 1.442695, %v400_v30 }
 0x55b   :  { %v401_v34 = vmul.f32 1.442695, %v399_v32  ;;  %v2692_v55 = vpop.permute.xlu1 %2691 }
 0x55c   :  { %2719 = vpow2.f32 %v403_v33  ;;  %v2694_v58 = vunpack.i.h.bf16 %v2692_v55  ;;  %v2693_v60 = vunpack.i.l.bf16 %v2692_v55 }
 0x55d   :  { %2721 = vpow2.f32 %v401_v34 }
 0x560   :  { %v597_v35 = vpop.xlane.xlu0 %596 }
 0x561   :  { %v601_v36 = vsub.f32 %v593_v25, %v597_v35 }
 0x563   :  { %v603_v40 = vmul.f32 1.442695, %v601_v36 }
 0x564   :  { %v600_v37 = vpop.xlane.xlu0 %599 }
 0x565   :  { %v602_v38 = vsub.f32 %v594_v27, %v600_v37  ;;  %v720_v27 = vsub.s32 0, %v3040_v26 }
 0x566   :  { %v2720_v39 = vpop.eup %2719 }
 0x567   :  { %v605_v41 = vmul.f32 1.442695, %v602_v38  ;;  %v408_v42 = vsel %vm305_vm5, %v2720_v39, 0.0  ;;  %v2722_v43 = vpop.eup %2721  ;;  %v721_v29 = vrot.slane %v3046_v28, %v720_v27 }
 0x568   :  { %409 = vadd.xlane.f32.xlu0 %v408_v42  ;;  %v405_v44 = vsel %vm305_vm5, %v2722_v43, 0.0 }
 0x569   :  { %2723 = vpow2.f32 %v605_v41 }
 0x56a   :  { %2725 = vpow2.f32 %v603_v40 }
 0x56c   :  { %406 = vadd.xlane.f32.xlu0 %v405_v44 }
 0x573   :  { %v2724_v45 = vpop.eup %2723 }
 0x574   :  { %v610_v46 = vsel %vm305_vm5, %v2724_v45, 0.0  ;;  %v2726_v47 = vpop.eup %2725 }
 0x575   :  { %611 = vadd.xlane.f32.xlu0 %v610_v46  ;;  %v607_v48 = vsel %vm305_vm5, %v2726_v47, 0.0  ;;  %v844_v46 = vld [vmem:[%s3330_s9 + $0x8] sm:$0xff] }
 0x579   :  { %608 = vadd.xlane.f32.xlu0 %v607_v48  ;;  %v845_v48 = vld [vmem:[%s3330_s9 + $0x10] sm:$0xff] }
 0x58f   :  { %2686 = vrot.lane.b32.xlu0 %v2960_v1, %s2805_s24  ;;  %v2558_v1 = vpack.c.bf16 %v2694_v58, %v2693_v60  ;;  %v833_v58 = vsub.s32 1, %v3040_v26  ;;  %v839_v60 = vsub.s32 2, %v3040_v26 }
 0x5f5   :  { %v410_v49 = vpop.xlane.xlu0 %409 }
 0x5f9   :  { %v407_v50 = vpop.xlane.xlu0 %406 }
 0x5fa   :  { %2727 = vrcp.f32 %v407_v50 }
 0x5fb   :  { %2729 = vrcp.f32 %v410_v49  ;;  %v846_v49 = vld [vmem:[%s3330_s9 + $0x18] sm:$0xff] }
 0x5fc   :  { %v2574_v50 = vpack.c.bf16 %v846_v49, %v845_v48 }
 0x602   :  { %v612_v51 = vpop.xlane.xlu0 %611 }
 0x604   :  { %v2728_v52 = vpop.eup %2727 }
 0x605   :  { %v412_v53 = vmul.f32 %v2728_v52, %v2722_v43  ;;  %v2730_v0 = vpop.eup %2729 }
 0x606   :  { %v609_v54 = vpop.xlane.xlu0 %608  ;;  %v414_v3 = vmul.f32 %v2730_v0, %v2720_v39 }
 0x607   :  { %2731 = vrcp.f32 %v609_v54  ;;  %2366 = vmatprep.mubr.msk.f32.mxu0 %vm305_vm5, %v412_v53 }
 0x608   :  { %2733 = vrcp.f32 %v612_v51 }
 0x60a   :  { %v2687_v56 = vpop.permute.xlu0 %2686 }
 0x60b   :  { %v2689_v61 = vunpack.i.h.bf16 %v2687_v56  ;;  %v2688_v62 = vunpack.i.l.bf16 %v2687_v56 }
 0x60d   :  { %v2548_v63 = vpack.c.bf16 %v2689_v61, %v2688_v62  ;;  %v834_v61 = vrot.slane %v3046_v28, %v833_v58 }
 0x60f   :  { %2549 = vmatprep.subr.bf16.mxu0 %v2548_v63 }
 0x610   :  { %2551 = vmatpush3.bf16.msra.mxu0 %v2548_v63 }
 0x611   :  { %v2732_v2 = vpop.eup %2731  ;;  %2559 = vmatprep.subr.bf16.mxu0 %v2558_v1 }
 0x612   :  { %v2734_v4 = vpop.eup %2733  ;;  %v614_v6 = vmul.f32 %v2732_v2, %v2726_v47  ;;  %v840_v2 = vrot.slane %v3046_v28, %v839_v60 }
 0x613   :  { %2367 = vmatmul.mubr.msk.f32.vlgmr.msra.gmra.mrb[2].mxu0 %vm305_vm5, %v414_v3  ;;  %v616_v7 = vmul.f32 %v2734_v4, %v2724_v45 }
 0x614   :  { %2561 = vmatpush3.bf16.msra.mxu0 %v2558_v1  ;;  %2380 = vmatprep.mubr.msk.f32.mxu0 %vm305_vm5, %v614_v6 }
 0x615   :  { %2563 = vmatprep.subr.bf16.mxu0 %v2562_v10 }
 0x617   :  { %2381 = vmatmul.mubr.msk.f32.vlgmr.msra.gmra.mrb[4].mxu0 %vm305_vm5, %v616_v7 }
 0x618   :  { %2565 = vmatpush3.bf16.msra.mxu0 %v2562_v10  ;;  %v2578_v10 = vpack.c.bf16 %v954_v9, %v953_v8  ;;  %v2176_v9 = vld [vmem:[%s3327_s6 + $0x28] sm:$0xff] }
 0x619   :  { %2567 = vmatprep.subr.bf16.mxu0 %v2566_v17 }
 0x61c   :  { %2569 = vmatpush3.bf16.msra.mxu0 %v2566_v17  ;;  %v957_v17 = vld [vmem:[%s3332_s11 + $0x20] sm:$0xff] }
 0x61d   :  { %2579 = vmatprep.subr.bf16.mxu0 %v2578_v10 }
 0x6e6   :  { %v2368_v18 = vpop.f32.mrb[2].mxu0 }
 0x6e7   :  { %v493_v19 = vpop.f32.mrb[3].mxu0 }
 0x6ea   :  { %v2382_v20 = vpop.f32.mrb[4].mxu0 }
 0x6eb   :  { %v695_v21 = vpop.f32.mrb[5].mxu0 }
 0x6ec   :  { %706 = vrot.lane.b32.xlu0 %v695_v21, %s2806_s18  ;;  %v959_v21 = vld [vmem:[%s3332_s11 + $0x30] sm:$0xff] }
 0x6f0   :  { %708 = vrot.lane.b32.xlu0 %v2382_v20, %s2806_s18 }
 0x75e   :  { %v707_v22 = vpop.permute.xlu0 %706 }
 0x75f   :  { %v712_v23 = vsel %vm305_vm5, %v493_v19, %v707_v22  ;;  %v958_v19 = vld [vmem:[%s3332_s11 + $0x28] sm:$0xff]  ;;  %v960_v22 = vld [vmem:[%s3332_s11 + $0x38] sm:$0xff] }
 0x760   :  { %2391 = vmatprep.mubr.msk.f32.mxu0 %vm164_vm4, %v712_v23  ;;  %v2586_v20 = vpack.c.bf16 %v958_v19, %v957_v17  ;;  %v2590_v23 = vpack.c.bf16 %v960_v22, %v959_v21 }
 0x762   :  { %v709_v24 = vpop.permute.xlu0 %708 }
 0x763   :  { %v713_v25 = vsel %vm305_vm5, %v2368_v18, %v709_v24  ;;  %v2582_v18 = vpack.c.bf16 %v956_v12, %v955_v11  ;;  %v2169_v24 = vld [vmem:[%s3331_s10] ss:$0 sm:$0xff]  ;;  %v2177_v11 = vld [vmem:[%s3327_s6 + $0x30] sm:$0xff]  ;;  %v2178_v12 = vld [vmem:[%s3327_s6 + $0x38] sm:$0xff] }
 0x764   :  { %2392 = vmatmul.mubr.msk.f32.vlgmr.msra.gmra.mrb[6].mxu0 %vm164_vm4, %v713_v25  ;;  %v2598_v17 = vpack.c.bf16 %v2178_v12, %v2177_v11 }
 0x765   :  { %2581 = vmatpush3.bf16.msra.mxu0 %v2578_v10 }
 0x766   :  { %2583 = vmatprep.subr.bf16.mxu0 %v2582_v18 }
 0x769   :  { %2585 = vmatpush3.bf16.msra.mxu0 %v2582_v18 }
 0x76a   :  { %2587 = vmatprep.subr.bf16.mxu0 %v2586_v20 }
 0x76d   :  { %2589 = vmatpush3.bf16.msra.mxu0 %v2586_v20 }
 0x76e   :  { %2591 = vmatprep.subr.bf16.mxu0 %v2590_v23 }
 0x771   :  { %2593 = vmatpush3.bf16.msra.mxu0 %v2590_v23 }
 0x837   :  { %v2393_v30 = vpop.f32.mrb[6].mxu0 }
 0x838   :  { %v800_v31 = vadd.f32 %v2393_v30, %v721_v29  ;;  %v794_v32 = vpop.f32.mrb[7].mxu0 }
 0x839   :  { %v795_v33 = vadd.f32 %v794_v32, %v721_v29 }
 0x83a   :  { %v804_v34 = vadd.f32 %v800_v31, %v2952_v59 }
 0x83b   :  { %v803_v13 = vadd.f32 %v795_v33, %v2948_v57  ;;  %v843_v57 = vld [vmem:[%s3330_s9] sm:$0xff] }
 0x83c   :  { %v808_v35 = vsel %vm164_vm4, %v804_v34, 0.0  ;;  %v2570_v47 = vpack.c.bf16 %v844_v46, %v843_v57 }
 0x83d   :  { %809 = vadd.xlane.f32.xlu0 %v808_v35  ;;  %v805_v36 = vsel %vm164_vm4, %v803_v13, 0.0 }
 0x83e   :  { %806 = vadd.xlane.f32.xlu1 %v805_v36  ;;  %2571 = vmatprep.subr.bf16.mxu1 %v2570_v47 }
 0x83f   :  { %2573 = vmatpush3.bf16.msra.mxu1 %v2570_v47  ;;  %v963_v47 = vsub.s32 3, %v3040_v26 }
 0x840   :  { %2575 = vmatprep.subr.bf16.mxu1 %v2574_v50 }
 0x841   :  { %v964_v48 = vrot.slane %v3046_v28, %v963_v47 }
 0x843   :  { %2577 = vmatpush3.bf16.msra.mxu1 %v2574_v50 }
 0x8ca   :  { %v810_v37 = vpop.xlane.xlu0 %809 }
 0x8cb   :  { %v812_v38 = vmul.f32 0.03125, %v810_v37  ;;  %v807_v39 = vpop.xlane.xlu1 %806 }
 0x8cc   :  { %v811_v40 = vmul.f32 0.03125, %v807_v39 }
 0x8cd   :  { %v814_v41 = vsub.f32 %v804_v34, %v812_v38 }
 0x8ce   :  { %v813_v42 = vsub.f32 %v803_v13, %v811_v40 }
 0x8cf   :  { %v816_v43 = vmul.f32 %v814_v41, %v814_v41 }
 0x8d0   :  { %v815_v44 = vmul.f32 %v813_v42, %v813_v42 }
 0x8d1   :  { %v820_v45 = vsel %vm164_vm4, %v816_v43, 0.0 }
 0x8d2   :  { %821 = vadd.xlane.f32.xlu1 %v820_v45  ;;  %v817_v59 = vsel %vm164_vm4, %v815_v44, 0.0 }
 0x8d3   :  { %818 = vadd.xlane.f32.xlu0 %v817_v59 }
 0x95f   :  { %v822_v51 = vpop.xlane.xlu1 %821 }
 0x960   :  { %v824_v52 = vmul.f32 0.03125, %v822_v51  ;;  %v819_v53 = vpop.xlane.xlu0 %818 }
 0x961   :  { %v823_v54 = vmul.f32 0.03125, %v819_v53 }
 0x962   :  { %v826_v55 = vadd.f32 1e-12, %v824_v52 }
 0x963   :  { %v825_v56 = vadd.f32 1e-12, %v823_v54 }
 0x964   :  { %2735 = vrsqrt.f32 %v826_v55 }
 0x965   :  { %2737 = vrsqrt.f32 %v825_v56 }
 0x96e   :  { %v2736_v62 = vpop.eup %2735 }
 0x96f   :  { %v2738_v63 = vpop.eup %2737  ;;  %v830_v0 = vmul.f32 %v2736_v62, %v814_v41 }
 0x970   :  { %v829_v1 = vmul.f32 %v2738_v63, %v813_v42 }
 0x971   :  { %v836_v3 = vmul.f32 %v834_v61, %v830_v0 }
 0x972   :  { %v835_v4 = vmul.f32 %v834_v61, %v829_v1 }
 0x973   :  { %v842_v7 = vadd.f32 %v840_v2, %v836_v3 }
 0x974   :  { %v841_v6 = vadd.f32 %v840_v2, %v835_v4 }
 0x976   :  { %2402 = vmatprep.mubr.msk.f32.mxu1 %vm164_vm4, %v841_v6 }
 0x977   :  { %2403 = vmatmul.mubr.msk.f32.vlgmr.msra.gmra.mrb[6].mxu1 %vm164_vm4, %v842_v7 }
 0xa4a   :  { %v2404_v25 = vpop.f32.mrb[6].mxu1 }
 0xa4b   :  { %v932_v29 = vadd.f32 %v2404_v25, %v2169_v24  ;;  %v926_v30 = vpop.f32.mrb[7].mxu1  ;;  %v1083_v25 = vsub.s32 5, %v3040_v26 }
 0xa4c   :  { %v927_v31 = vadd.f32 %v2169_v24, %v926_v30  ;;  %v1077_v24 = vsub.s32 4, %v3040_v26  ;;  %v1971_v26 = vld [vmem:[%s3323_s2] sm:$0x3] }
 0xa4d   :  { %v938_v32 = vmul.f32 0.044715, %v932_v29  ;;  %v936_v59 = vmul.f32 0.5, %v932_v29 }
 0xa4e   :  { %v937_v33 = vmul.f32 0.044715, %v927_v31  ;;  %v935_v44 = vmul.f32 0.5, %v927_v31 }
 0xa4f   :  { %v940_v34 = vmul.f32 %v938_v32, %v932_v29 }
 0xa50   :  { %v939_v13 = vmul.f32 %v937_v33, %v927_v31 }
 0xa51   :  { %v942_v35 = vmul.f32 %v940_v34, %v932_v29  ;;  %v1084_v34 = vrot.slane %v3046_v28, %v1083_v25 }
 0xa52   :  { %v941_v36 = vmul.f32 %v939_v13, %v927_v31 }
 0xa53   :  { %v944_v37 = vadd.f32 %v942_v35, %v932_v29  ;;  %v1078_v29 = vrot.slane %v3046_v28, %v1077_v24 }
 0xa54   :  { %v943_v38 = vadd.f32 %v941_v36, %v927_v31 }
 0xa55   :  { %v946_v39 = vmul.f32 0.7978846, %v944_v37 }
 0xa56   :  { %v945_v40 = vmul.f32 0.7978846, %v943_v38  ;;  %v2180_v38 = vld [vmem:[%s3328_s7 + $0x1] ss:$0 sm:$0xff] }
 0xa57   :  { %2739 = vtanh.f32 %v946_v39 }
 0xa58   :  { %2741 = vtanh.f32 %v945_v40 }
 0xa61   :  { %v2740_v41 = vpop.eup %2739 }
 0xa62   :  { %v2742_v42 = vpop.eup %2741  ;;  %v950_v43 = vadd.f32 1.0, %v2740_v41 }
 0xa63   :  { %v949_v45 = vadd.f32 1.0, %v2742_v42 }
 0xa64   :  { %v952_v46 = vmul.f32 %v950_v43, %v936_v59 }
 0xa65   :  { %v951_v57 = vmul.f32 %v949_v45, %v935_v44 }
 0xa67   :  { %2421 = vmatprep.mubr.msk.f32.mxu0 %vm965_vm9, %v951_v57 }
 0xa68   :  { %2422 = vmatmul.mubr.msk.f32.vlgmr.msra.gmra.mrb[8].mxu0 %vm965_vm9, %v952_v46 }
 0xb3b   :  { %v2423_v49 = vpop.f32.mrb[8].mxu0 }
 0xb3c   :  { %v1044_v50 = vadd.f32 %v2423_v49, %v964_v48  ;;  %v1038_v51 = vpop.f32.mrb[9].mxu0 }
 0xb3d   :  { %v1039_v52 = vadd.f32 %v1038_v51, %v964_v48 }
 0xb3e   :  { %v1048_v53 = vadd.f32 %v1044_v50, %v842_v7 }
 0xb3f   :  { %v1047_v54 = vadd.f32 %v1039_v52, %v841_v6  ;;  %v2175_v6 = vld [vmem:[%s3327_s6 + $0x20] sm:$0xff] }
 0xb40   :  { %v1052_v55 = vsel %vm164_vm4, %v1048_v53, 0.0  ;;  %v2594_v10 = vpack.c.bf16 %v2176_v9, %v2175_v6 }
 0xb41   :  { %1053 = vadd.xlane.f32.xlu1 %v1052_v55  ;;  %v1049_v56 = vsel %vm164_vm4, %v1047_v54, 0.0 }
 0xb42   :  { %1050 = vadd.xlane.f32.xlu0 %v1049_v56  ;;  %2595 = vmatprep.subr.bf16.mxu1 %v2594_v10 }
 0xb43   :  { %2597 = vmatpush3.bf16.msra.mxu1 %v2594_v10 }
 0xb44   :  { %2599 = vmatprep.subr.bf16.mxu1 %v2598_v17 }
 0xb47   :  { %2601 = vmatpush3.bf16.msra.mxu1 %v2598_v17 }
 0xbce   :  { %v1054_v61 = vpop.xlane.xlu1 %1053 }
 0xbcf   :  { %v1056_v62 = vmul.f32 0.03125, %v1054_v61  ;;  %v1051_v63 = vpop.xlane.xlu0 %1050 }
 0xbd0   :  { %v1055_v0 = vmul.f32 0.03125, %v1051_v63 }
 0xbd1   :  { %v1058_v1 = vsub.f32 %v1048_v53, %v1056_v62 }
 0xbd2   :  { %v1057_v2 = vsub.f32 %v1047_v54, %v1055_v0 }
 0xbd3   :  { %v1060_v3 = vmul.f32 %v1058_v1, %v1058_v1 }
 0xbd4   :  { %v1059_v4 = vmul.f32 %v1057_v2, %v1057_v2 }
 0xbd5   :  { %v1064_v8 = vsel %vm164_vm4, %v1060_v3, 0.0 }
 0xbd6   :  { %1065 = vadd.xlane.f32.xlu1 %v1064_v8  ;;  %v1061_v7 = vsel %vm164_vm4, %v1059_v4, 0.0 }
 0xbd7   :  { %1062 = vadd.xlane.f32.xlu0 %v1061_v7 }
 0xc63   :  { %v1066_v18 = vpop.xlane.xlu1 %1065 }
 0xc64   :  { %v1068_v19 = vmul.f32 0.03125, %v1066_v18  ;;  %v1063_v20 = vpop.xlane.xlu0 %1062 }
 0xc65   :  { %v1067_v21 = vmul.f32 0.03125, %v1063_v20 }
 0xc66   :  { %v1070_v22 = vadd.f32 1e-12, %v1068_v19 }
 0xc67   :  { %v1069_v23 = vadd.f32 1e-12, %v1067_v21 }
 0xc68   :  { %2743 = vrsqrt.f32 %v1070_v22 }
 0xc69   :  { %2745 = vrsqrt.f32 %v1069_v23 }
 0xc72   :  { %v2744_v30 = vpop.eup %2743 }
 0xc73   :  { %v2746_v31 = vpop.eup %2745  ;;  %v1074_v32 = vmul.f32 %v2744_v30, %v1058_v1 }
 0xc74   :  { %v1073_v33 = vmul.f32 %v2746_v31, %v1057_v2 }
 0xc75   :  { %v1080_v13 = vmul.f32 %v1078_v29, %v1074_v32 }
 0xc76   :  { %v1079_v35 = vmul.f32 %v1078_v29, %v1073_v33 }
 0xc77   :  { %v3138_v37 = vadd.f32 %v1084_v34, %v1080_v13 }
 0xc78   :  { %v3136_v36 = vadd.f32 %v1084_v34, %v1079_v35 }
 0xc7a   :  { %2432 = vmatprep.mubr.msk.f32.mxu1 %vm164_vm4, %v3136_v36 }
 0xc7b   :  { %2433 = vmatmul.mubr.msk.f32.vlgmr.msra.gmra.mrb[8].mxu1 %vm164_vm4, %v3138_v37 }
 0xd4e   :  { %v2434_v39 = vpop.f32.mrb[8].mxu1 }
 0xd4f   :  { %v1180_v40 = vadd.f32 %v2434_v39, %v2180_v38  ;;  %v1174_v41 = vpop.f32.mrb[9].mxu1 }
 0xd50   :  { %v1175_v28 = vadd.f32 %v2180_v38, %v1174_v41 }
 0xd52   :  { %2439 = vmatprep.mubr.msk.f32.mxu1 %vm305_vm5, %v1175_v28  ;;  %v3148_v42 = vpack.i.bf16 %v1180_v40, %v1175_v28 }
 0xd54   :  { %2701 = vrot.lane.b32.xlu1 %v3148_v42, %s2802_s0  ;;  %2696 = vrot.lane.b32.xlu0 %v3148_v42, %s2801_s5 }
 0xd58   :  { %1383 = vrot.lane.b32.xlu1 %v1175_v28, %s2803_s3  ;;  %1385 = vrot.lane.b32.xlu0 %v1180_v40, %s2803_s3 }
 0xdc6   :  { %v2702_v43 = vpop.permute.xlu1 %2701  ;;  %v2697_v44 = vpop.permute.xlu0 %2696 }
 0xdc7   :  { %v2704_v45 = vunpack.i.h.bf16 %v2702_v43  ;;  %v2703_v59 = vunpack.i.l.bf16 %v2702_v43  ;;  %v2699_v57 = vunpack.i.h.bf16 %v2697_v44  ;;  %v2698_v46 = vunpack.i.l.bf16 %v2697_v44 }
 0xdc9   :  { %v2602_v48 = vpack.c.bf16 %v2699_v57, %v2698_v46  ;;  %v2612_v49 = vpack.c.bf16 %v2704_v45, %v2703_v59 }
 0xdca   :  { %v1384_v50 = vpop.permute.xlu1 %1383  ;;  %v1386_v51 = vpop.permute.xlu0 %1385 }
 0xdcb   :  { %2604 = vmatprep.subr.msk.bf16.mxu1 %vm2970_vm6, %v2602_v48 }
 0xdcc   :  { %2607 = vmatpush3.bf16.xpose.msk.msra.mxu1 %vm2970_vm6, %v2602_v48 }
 0xdcd   :  { %2614 = vmatprep.subr.msk.bf16.mxu1 %vm2970_vm6, %v2612_v49 }
 0xdd3   :  { %2440 = vmatmul.mubr.msk.f32.vlgmr.msra.gmra.mrb[10].mxu1 %vm305_vm5, %v1180_v40 }
 0xdd4   :  { %2617 = vmatpush3.bf16.xpose.msk.msra.mxu1 %vm2970_vm6, %v2612_v49  ;;  %2453 = vmatprep.mubr.msk.f32.mxu1 %vm305_vm5, %v1384_v50  ;;  %v2195_v50 = vld [vmem:[%s3329_s8 + $0x20] sm:$0xff] }
 0xddb   :  { %2454 = vmatmul.mubr.msk.f32.vlgmr.msra.gmra.mrb[12].mxu1 %vm305_vm5, %v1386_v51  ;;  %v2196_v51 = vld [vmem:[%s3329_s8 + $0x28] sm:$0xff] }
 0xea6   :  { %v2441_v52 = vpop.f32.mrb[10].mxu1 }
 0xea7   :  { %v1273_v53 = vsel %vm390_vm7, %v2441_v52, -3.4028235e+38  ;;  %v1263_v54 = vpop.f32.mrb[11].mxu1  ;;  %v2197_v52 = vld [vmem:[%s3329_s8 + $0x30] sm:$0xff] }
 0xea8   :  { %v1272_v55 = vsel %vm389_vm8, %v1263_v54, -3.4028235e+38  ;;  %v1277_v56 = vsel %vm305_vm5, %v1273_v53, -inf  ;;  %v2198_v54 = vld [vmem:[%s3329_s8 + $0x38] sm:$0xff] }
 0xea9   :  { %1278 = vmax.xlane.f32.xlu0 %v1277_v56  ;;  %v1274_v61 = vsel %vm305_vm5, %v1272_v55, -inf }
 0xeaa   :  { %1275 = vmax.xlane.f32.xlu1 %v1274_v61 }
 0xeae   :  { %v2455_v5 = vpop.f32.mrb[12].mxu1 }
 0xeaf   :  { %v1475_v62 = vsel %vm390_vm7, %v2455_v5, -3.4028235e+38  ;;  %v1465_v63 = vpop.f32.mrb[13].mxu1 }
 0xeb0   :  { %v1474_v0 = vsel %vm389_vm8, %v1465_v63, -3.4028235e+38  ;;  %v1479_v1 = vsel %vm305_vm5, %v1475_v62, -inf }
 0xeb1   :  { %1480 = vmax.xlane.f32.xlu1 %v1479_v1  ;;  %v1476_v2 = vsel %vm305_vm5, %v1474_v0, -inf }
 0xeb2   :  { %1477 = vmax.xlane.f32.xlu0 %v1476_v2 }
 0xf36   :  { %v1279_v3 = vpop.xlane.xlu0 %1278 }
 0xf37   :  { %v1281_v4 = vsub.f32 %v1273_v53, %v1279_v3  ;;  %v1276_v8 = vpop.xlane.xlu1 %1275  ;;  %v2622_v53 = vpack.c.bf16 %v2196_v51, %v2195_v50  ;;  %v3212_v3 = vld [vmem:[%s3333_s12 + $0x8] sm:$0x3f]  ;;  %v2212_v51 = vld [vmem:[%s3332_s11 + $0x58] sm:$0xff] }
 0xf38   :  { %v1280_v7 = vsub.f32 %v1272_v55, %v1276_v8  ;;  %v2626_v55 = vpack.c.bf16 %v2198_v54, %v2197_v52  ;;  %v2213_v52 = vld [vmem:[%s3332_s11 + $0x60] sm:$0xff]  ;;  %v2214_v54 = vld [vmem:[%s3332_s11 + $0x68] sm:$0xff] }
 0xf39   :  { %v1284_v6 = vmul.f32 1.442695, %v1281_v4  ;;  %v1603_v4 = vrot.slane %v3212_v3, %v720_v27 }
 0xf3a   :  { %v1282_v9 = vmul.f32 1.442695, %v1280_v7 }
 0xf3b   :  { %2747 = vpow2.f32 %v1284_v6 }
 0xf3c   :  { %2749 = vpow2.f32 %v1282_v9 }
 0xf3e   :  { %v1481_v14 = vpop.xlane.xlu1 %1480 }
 0xf3f   :  { %v1483_v10 = vsub.f32 %v1475_v62, %v1481_v14  ;;  %v1478_v11 = vpop.xlane.xlu0 %1477 }
 0xf40   :  { %v1482_v12 = vsub.f32 %v1474_v0, %v1478_v11 }
 0xf41   :  { %v1486_v15 = vmul.f32 1.442695, %v1483_v10 }
 0xf42   :  { %v1484_v17 = vmul.f32 1.442695, %v1482_v12 }
 0xf43   :  { %2751 = vpow2.f32 %v1486_v15 }
 0xf44   :  { %2753 = vpow2.f32 %v1484_v17 }
 0xf45   :  { %v2748_v18 = vpop.eup %2747 }
 0xf46   :  { %v2750_v19 = vpop.eup %2749  ;;  %v1289_v20 = vsel %vm305_vm5, %v2748_v18, 0.0 }
 0xf47   :  { %1290 = vadd.xlane.f32.xlu1 %v1289_v20  ;;  %v1286_v21 = vsel %vm305_vm5, %v2750_v19, 0.0 }
 0xf48   :  { %1287 = vadd.xlane.f32.xlu0 %v1286_v21 }
 0xf4d   :  { %v2752_v22 = vpop.eup %2751 }
 0xf4e   :  { %v2754_v23 = vpop.eup %2753  ;;  %v1491_v29 = vsel %vm305_vm5, %v2752_v22, 0.0 }
 0xf4f   :  { %1492 = vadd.xlane.f32.xlu1 %v1491_v29  ;;  %v1488_v30 = vsel %vm305_vm5, %v2754_v23, 0.0  ;;  %v2202_v29 = vld [vmem:[%s3330_s9 + $0x28] sm:$0xff] }
 0xf50   :  { %1489 = vadd.xlane.f32.xlu0 %v1488_v30 }
 0xf60   :  { %2711 = vrot.lane.b32.xlu1 %v3148_v42, %s2804_s1 }
 0xf66   :  { %2706 = vrot.lane.b32.xlu0 %v3148_v42, %s2805_s24 }
 0xfd4   :  { %v1291_v32 = vpop.xlane.xlu1 %1290 }
 0xfd5   :  { %v1288_v31 = vpop.xlane.xlu0 %1287 }
 0xfd6   :  { %2755 = vrcp.f32 %v1288_v31  ;;  %v2203_v31 = vld [vmem:[%s3330_s9 + $0x30] sm:$0xff] }
 0xfd7   :  { %2757 = vrcp.f32 %v1291_v32  ;;  %v2204_v32 = vld [vmem:[%s3330_s9 + $0x38] sm:$0xff] }
 0xfdc   :  { %v1493_v33 = vpop.xlane.xlu1 %1492 }
 0xfdd   :  { %v1490_v34 = vpop.xlane.xlu0 %1489 }
 0xfde   :  { %2759 = vrcp.f32 %v1490_v34 }
 0xfdf   :  { %2761 = vrcp.f32 %v1493_v33  ;;  %v2634_v33 = vpack.c.bf16 %v2204_v32, %v2203_v31 }
 0xfe0   :  { %v2756_v13 = vpop.eup %2755  ;;  %v2712_v35 = vpop.permute.xlu1 %2711 }
 0xfe1   :  { %v2707_v38 = vpop.permute.xlu0 %2706  ;;  %v1293_v39 = vmul.f32 %v2756_v13, %v2750_v19  ;;  %v2714_v40 = vunpack.i.h.bf16 %v2712_v35  ;;  %v2713_v41 = vunpack.i.l.bf16 %v2712_v35  ;;  %v2758_v42 = vpop.eup %2757 }
 0xfe2   :  { %v2709_v28 = vunpack.i.h.bf16 %v2707_v38  ;;  %v2708_v43 = vunpack.i.l.bf16 %v2707_v38  ;;  %v1295_v57 = vmul.f32 %v2758_v42, %v2748_v18 }
 0xfe3   :  { %2446 = vmatprep.mubr.msk.f32.mxu0 %vm305_vm5, %v1293_v39  ;;  %v2618_v45 = vpack.c.bf16 %v2714_v40, %v2713_v41  ;;  %v1716_v41 = vrot.slane %v3212_v3, %v833_v58  ;;  %v2209_v58 = vld [vmem:[%s3332_s11 + $0x40] sm:$0xff] }
 0xfe4   :  { %v2608_v44 = vpack.c.bf16 %v2709_v28, %v2708_v43 }
 0xfe6   :  { %2609 = vmatprep.subr.bf16.mxu0 %v2608_v44 }
 0xfe7   :  { %2611 = vmatpush3.bf16.msra.mxu0 %v2608_v44 }
 0xfe8   :  { %v2760_v59 = vpop.eup %2759  ;;  %2619 = vmatprep.subr.bf16.mxu0 %v2618_v45 }
 0xfe9   :  { %v2762_v46 = vpop.eup %2761  ;;  %v1495_v48 = vmul.f32 %v2760_v59, %v2754_v23 }
 0xfea   :  { %2447 = vmatmul.mubr.msk.f32.vlgmr.msra.gmra.mrb[10].mxu0 %vm305_vm5, %v1295_v57  ;;  %v1497_v49 = vmul.f32 %v2762_v46, %v2752_v22 }
 0xfeb   :  { %2621 = vmatpush3.bf16.msra.mxu0 %v2618_v45  ;;  %2460 = vmatprep.mubr.msk.f32.mxu0 %vm305_vm5, %v1495_v48  ;;  %v1722_v45 = vrot.slane %v3212_v3, %v839_v60  ;;  %v2211_v60 = vld [vmem:[%s3332_s11 + $0x50] sm:$0xff] }
 0xfec   :  { %2623 = vmatprep.subr.bf16.mxu0 %v2622_v53 }
 0xfee   :  { %2461 = vmatmul.mubr.msk.f32.vlgmr.msra.gmra.mrb[12].mxu0 %vm305_vm5, %v1497_v49  ;;  %v2210_v49 = vld [vmem:[%s3332_s11 + $0x48] sm:$0xff] }
 0xfef   :  { %2625 = vmatpush3.bf16.msra.mxu0 %v2622_v53  ;;  %v2638_v50 = vpack.c.bf16 %v2210_v49, %v2209_v58  ;;  %v2642_v53 = vpack.c.bf16 %v2212_v51, %v2211_v60 }
 0xff0   :  { %2627 = vmatprep.subr.bf16.mxu0 %v2626_v55 }
 0xff3   :  { %2629 = vmatpush3.bf16.msra.mxu0 %v2626_v55  ;;  %v2646_v55 = vpack.c.bf16 %v2214_v54, %v2213_v52 }
 0xff4   :  { %2639 = vmatprep.subr.bf16.mxu0 %v2638_v50 }
0x10bd   :  { %v2448_v56 = vpop.f32.mrb[10].mxu0 }
0x10be   :  { %v1374_v61 = vpop.f32.mrb[11].mxu0 }
0x10c1   :  { %v2462_v5 = vpop.f32.mrb[12].mxu0 }
0x10c2   :  { %1589 = vrot.lane.b32.xlu0 %v2462_v5, %s2806_s18  ;;  %v1576_v62 = vpop.f32.mrb[13].mxu0 }
0x10c3   :  { %1587 = vrot.lane.b32.xlu1 %v1576_v62, %s2806_s18  ;;  %v2206_v62 = vld [vmem:[%s3331_s10 + $0x1] ss:$0 sm:$0xff] }
0x1134   :  { %v1590_v63 = vpop.permute.xlu0 %1589 }
0x1135   :  { %v1588_v0 = vpop.permute.xlu1 %1587  ;;  %v1594_v2 = vsel %vm305_vm5, %v2448_v56, %v1590_v63  ;;  %v2215_v56 = vld [vmem:[%s3332_s11 + $0x70] sm:$0xff] }
0x1136   :  { %v1593_v1 = vsel %vm305_vm5, %v1374_v61, %v1588_v0  ;;  %v2216_v61 = vld [vmem:[%s3332_s11 + $0x78] sm:$0xff] }
0x1137   :  { %2471 = vmatprep.mubr.msk.f32.mxu0 %vm164_vm4, %v1593_v1  ;;  %v2650_v5 = vpack.c.bf16 %v2216_v61, %v2215_v56 }
0x1138   :  { %2472 = vmatmul.mubr.msk.f32.vlgmr.msra.gmra.mrb[14].mxu0 %vm164_vm4, %v1594_v2 }
0x1139   :  { %2641 = vmatpush3.bf16.msra.mxu0 %v2638_v50  ;;  %v1962_v50 = vrot.slane %v3212_v3, %v1077_v24  ;;  %v2046_v24 = vld [vmem:[%s3334_s13 + $0x8] sm:$0xff] }
0x113a   :  { %2643 = vmatprep.subr.bf16.mxu0 %v2642_v53 }
0x113d   :  { %2645 = vmatpush3.bf16.msra.mxu0 %v2642_v53  ;;  %v1968_v53 = vrot.slane %v3212_v3, %v1083_v25 }
0x113e   :  { %2647 = vmatprep.subr.bf16.mxu0 %v2646_v55 }
0x1141   :  { %2649 = vmatpush3.bf16.msra.mxu0 %v2646_v55 }
0x1142   :  { %2651 = vmatprep.subr.bf16.mxu0 %v2650_v5 }
0x1145   :  { %2653 = vmatpush3.bf16.msra.mxu0 %v2650_v5 }
0x120b   :  { %v2473_v8 = vpop.f32.mrb[14].mxu0 }
0x120c   :  { %v1682_v7 = vadd.f32 %v2473_v8, %v1603_v4  ;;  %v1676_v6 = vpop.f32.mrb[15].mxu0 }
0x120d   :  { %v1677_v9 = vadd.f32 %v1676_v6, %v1603_v4 }
0x120e   :  { %v1686_v14 = vadd.f32 %v1682_v7, %v3138_v37 }
0x120f   :  { %v1685_v10 = vadd.f32 %v1677_v9, %v3136_v36  ;;  %v2201_v36 = vld [vmem:[%s3330_s9 + $0x20] sm:$0xff] }
0x1210   :  { %v1690_v11 = vsel %vm164_vm4, %v1686_v14, 0.0  ;;  %v2630_v30 = vpack.c.bf16 %v2202_v29, %v2201_v36 }
0x1211   :  { %1691 = vadd.xlane.f32.xlu0 %v1690_v11  ;;  %v1687_v12 = vsel %vm164_vm4, %v1685_v10, 0.0 }
0x1212   :  { %1688 = vadd.xlane.f32.xlu1 %v1687_v12  ;;  %2631 = vmatprep.subr.bf16.mxu1 %v2630_v30 }
0x1213   :  { %2633 = vmatpush3.bf16.msra.mxu1 %v2630_v30 }
0x1214   :  { %2635 = vmatprep.subr.bf16.mxu1 %v2634_v33 }
0x1217   :  { %2637 = vmatpush3.bf16.msra.mxu1 %v2634_v33 }
0x129e   :  { %v1692_v15 = vpop.xlane.xlu0 %1691 }
0x129f   :  { %v1694_v17 = vmul.f32 0.03125, %v1692_v15  ;;  %v1689_v18 = vpop.xlane.xlu1 %1688 }
0x12a0   :  { %v1693_v19 = vmul.f32 0.03125, %v1689_v18 }
0x12a1   :  { %v1696_v20 = vsub.f32 %v1686_v14, %v1694_v17 }
0x12a2   :  { %v1695_v27 = vsub.f32 %v1685_v10, %v1693_v19 }
0x12a3   :  { %v1698_v21 = vmul.f32 %v1696_v20, %v1696_v20 }
0x12a4   :  { %v1697_v22 = vmul.f32 %v1695_v27, %v1695_v27 }
0x12a5   :  { %v1702_v23 = vsel %vm164_vm4, %v1698_v21, 0.0 }
0x12a6   :  { %1703 = vadd.xlane.f32.xlu1 %v1702_v23  ;;  %v1699_v37 = vsel %vm164_vm4, %v1697_v22, 0.0 }
0x12a7   :  { %1700 = vadd.xlane.f32.xlu0 %v1699_v37  ;;  %v1849_v37 = vrot.slane %v3212_v3, %v963_v47  ;;  %v2047_v3 = vld [vmem:[%s3334_s13 + $0x10] sm:$0xff] }
0x1333   :  { %v1704_v34 = vpop.xlane.xlu1 %1703 }
0x1334   :  { %v1706_v13 = vmul.f32 0.03125, %v1704_v34  ;;  %v1701_v35 = vpop.xlane.xlu0 %1700 }
0x1335   :  { %v1705_v38 = vmul.f32 0.03125, %v1701_v35 }
0x1336   :  { %v1708_v39 = vadd.f32 1e-12, %v1706_v13 }
0x1337   :  { %v1707_v40 = vadd.f32 1e-12, %v1705_v38 }
0x1338   :  { %2763 = vrsqrt.f32 %v1708_v39 }
0x1339   :  { %2765 = vrsqrt.f32 %v1707_v40 }
0x1342   :  { %v2764_v28 = vpop.eup %2763 }
0x1343   :  { %v2766_v43 = vpop.eup %2765  ;;  %v1712_v44 = vmul.f32 %v2764_v28, %v1696_v20 }
0x1344   :  { %v1711_v42 = vmul.f32 %v2766_v43, %v1695_v27 }
0x1345   :  { %v1718_v59 = vmul.f32 %v1716_v41, %v1712_v44 }
0x1346   :  { %v1717_v57 = vmul.f32 %v1716_v41, %v1711_v42 }
0x1347   :  { %v1724_v48 = vadd.f32 %v1722_v45, %v1718_v59 }
0x1348   :  { %v1723_v46 = vadd.f32 %v1722_v45, %v1717_v57  ;;  %v2807_v45 = vmov 0.0|0.0  }
0x1349   :  { %2654 = vmatprep.subr.bf16.mxu1 %v2807_v45 }
0x134a   :  { %2482 = vmatprep.mubr.msk.f32.mxu1 %vm164_vm4, %v1723_v46 }
0x134b   :  { %2483 = vmatmul.mubr.msk.f32.vlgmr.msra.gmra.mrb[14].mxu1 %vm164_vm4, %v1724_v48 }
0x134c   :  { %2508 = vmatprep.mubr.msk.f32.mxu1 %vm2808_vm10, %v2800_v16 }
0x141e   :  { %v2484_v63 = vpop.f32.mrb[14].mxu1 }
0x141f   :  { %v1816_v0 = vadd.f32 %v2484_v63, %v2206_v62  ;;  %v1810_v1 = vpop.f32.mrb[15].mxu1 }
0x1420   :  { %v1811_v2 = vadd.f32 %v2206_v62, %v1810_v1  ;;  %v2045_v62 = vld [vmem:[%s3334_s13] sm:$0xff] }
0x1421   :  { %v1822_v4 = vmul.f32 0.044715, %v1816_v0  ;;  %v1820_v21 = vmul.f32 0.5, %v1816_v0  ;;  %v2658_v25 = vpack.c.bf16 %v2046_v24, %v2045_v62 }
0x1422   :  { %v1821_v8 = vmul.f32 0.044715, %v1811_v2  ;;  %v1819_v20 = vmul.f32 0.5, %v1811_v2 }
0x1423   :  { %v1824_v7 = vmul.f32 %v1822_v4, %v1816_v0 }
0x1424   :  { %v1823_v6 = vmul.f32 %v1821_v8, %v1811_v2  ;;  %v2220_v8 = vld [vmem:[%s3335_s14] ss:$0 sm:$0xff] }
0x1425   :  { %v1826_v9 = vmul.f32 %v1824_v7, %v1816_v0 }
0x1426   :  { %v1825_v14 = vmul.f32 %v1823_v6, %v1811_v2 }
0x1427   :  { %v1828_v10 = vadd.f32 %v1826_v9, %v1816_v0  ;;  %v2048_v0 = vld [vmem:[%s3334_s13 + $0x18] sm:$0xff]  ;;  %s2775_s13 = scalar_lea.vmem %s2138_s25, 32 }
0x1428   :  { %v1827_v11 = vadd.f32 %v1825_v14, %v1811_v2  ;;  %v2661_v1 = vpack.c.bf16 %v2048_v0, %v2047_v3  ;;  %p2776_p0 = scmp.ne.s32.totalorder %s2138_s25, %s2775_s13  ;;  %p2781_p2 = scmp.lt.s32.totalorder %s2775_s13, %s2775_s13 }
0x1429   :  { %v1830_v12 = vmul.f32 0.7978846, %v1828_v10 }
0x142a   :  { %v1829_v15 = vmul.f32 0.7978846, %v1827_v11  ;;  %p2782_p3 = por %p2781_p2, %p2780_p1 }
0x142b   :  { %2767 = vtanh.f32 %v1830_v12 }
0x142c   :  { %2769 = vtanh.f32 %v1829_v15  ;;  %p2783_p4 = pnand %p2782_p3, %p2776_p0 }
0x1435   :  { %v2768_v17 = vpop.eup %2767 }
0x1436   :  { %v2770_v18 = vpop.eup %2769  ;;  %v1834_v19 = vadd.f32 1.0, %v2768_v17 }
0x1437   :  { %v1833_v27 = vadd.f32 1.0, %v2770_v18 }
0x1438   :  { %v1836_v23 = vmul.f32 %v1834_v19, %v1820_v21 }
0x1439   :  { %v1835_v22 = vmul.f32 %v1833_v27, %v1819_v20 }
0x143b   :  { %2501 = vmatprep.mubr.msk.f32.mxu0 %vm965_vm9, %v1835_v22 }
0x143c   :  { %2502 = vmatmul.mubr.msk.f32.vlgmr.msra.gmra.mrb[16].mxu0 %vm965_vm9, %v1836_v23 }
0x150f   :  { %v2503_v36 = vpop.f32.mrb[16].mxu0 }
0x1510   :  { %v1928_v29 = vadd.f32 %v2503_v36, %v1849_v37  ;;  %v1922_v30 = vpop.f32.mrb[17].mxu0 }
0x1511   :  { %v1923_v31 = vadd.f32 %v1922_v30, %v1849_v37 }
0x1512   :  { %v1932_v32 = vadd.f32 %v1928_v29, %v1724_v48 }
0x1513   :  { %v1931_v33 = vadd.f32 %v1923_v31, %v1723_v46 }
0x1514   :  { %v1936_v34 = vsel %vm164_vm4, %v1932_v32, 0.0 }
0x1515   :  { %1937 = vadd.xlane.f32.xlu1 %v1936_v34  ;;  %v1933_v13 = vsel %vm164_vm4, %v1931_v33, 0.0 }
0x1516   :  { %1934 = vadd.xlane.f32.xlu0 %v1933_v13 }
0x15a2   :  { %v1938_v35 = vpop.xlane.xlu1 %1937 }
0x15a3   :  { %v1940_v38 = vmul.f32 0.03125, %v1938_v35  ;;  %v1935_v39 = vpop.xlane.xlu0 %1934 }
0x15a4   :  { %v1939_v40 = vmul.f32 0.03125, %v1935_v39 }
0x15a5   :  { %v1942_v41 = vsub.f32 %v1932_v32, %v1940_v38 }
0x15a6   :  { %v1941_v28 = vsub.f32 %v1931_v33, %v1939_v40 }
0x15a7   :  { %v1944_v43 = vmul.f32 %v1942_v41, %v1942_v41 }
0x15a8   :  { %v1943_v47 = vmul.f32 %v1941_v28, %v1941_v28 }
0x15a9   :  { %v1948_v44 = vsel %vm164_vm4, %v1944_v43, 0.0 }
0x15aa   :  { %1949 = vadd.xlane.f32.xlu1 %v1948_v44  ;;  %v1945_v42 = vsel %vm164_vm4, %v1943_v47, 0.0 }
0x15ab   :  { %1946 = vadd.xlane.f32.xlu0 %v1945_v42 }
0x1637   :  { %v1950_v59 = vpop.xlane.xlu1 %1949 }
0x1638   :  { %v1952_v57 = vmul.f32 0.03125, %v1950_v59  ;;  %v1947_v46 = vpop.xlane.xlu0 %1946 }
0x1639   :  { %v1951_v48 = vmul.f32 0.03125, %v1947_v46 }
0x163a   :  { %v1954_v58 = vadd.f32 1e-12, %v1952_v57 }
0x163b   :  { %v1953_v49 = vadd.f32 1e-12, %v1951_v48 }
0x163c   :  { %2771 = vrsqrt.f32 %v1954_v58 }
0x163d   :  { %2773 = vrsqrt.f32 %v1953_v49 }
0x1646   :  { %v2772_v60 = vpop.eup %2771 }
0x1647   :  { %v2774_v51 = vpop.eup %2773  ;;  %v1958_v52 = vmul.f32 %v2772_v60, %v1942_v41 }
0x1648   :  { %v1957_v54 = vmul.f32 %v2774_v51, %v1941_v28 }
0x1649   :  { %v1964_v55 = vmul.f32 %v1962_v50, %v1958_v52 }
0x164a   :  { %v1963_v56 = vmul.f32 %v1962_v50, %v1957_v54 }
0x164b   :  { %v1970_v61 = vadd.f32 %v1968_v53, %v1964_v55 }
0x164c   :  { %v1969_v5 = vadd.f32 %v1968_v53, %v1963_v56 }
0x164e   :  { %v2655_v63 = vpack.c.bf16 %v1970_v61, %v1969_v5 }
0x1650   :  { %2656 = vmatpush3.bf16.msra.mxu1 %v2655_v63 }
0x1651   :  { %2657 = vmatprep.subr.bf16.mxu1 %v2807_v45 }
0x1653   :  { %2509 = vmatmul.mubr.msk.f32.vlgmr.msra.gmra.mrb[16].mxu1 %vm305_vm5, %v1971_v26 }
0x1654   :  { %2659 = vmatpush3.bf16.msra.mxu1 %v2658_v25  ;;  %2519 = vmatprep.mubr.msk.f32.mxu1 %vm2808_vm10, %v2800_v16 }
0x1655   :  { %2660 = vmatprep.subr.bf16.mxu1 %v2807_v45 }
0x1658   :  { %2662 = vmatpush3.bf16.msra.mxu1 %v2661_v1 }
0x1726   :  { %v2041_v2 = vpop.f32.mrb[16].mxu1 }
0x1727   :  { %v2510_v4 = vpop.f32.mrb[17].mxu1  ;;  %2520 = vmatmul.mubr.msk.f32.vlgmr.msra.gmra.mrb[18].mxu1 %vm164_vm4, %v2041_v2 }
0x17fa   :  { %v2125_v7 = vpop.f32.mrb[18].mxu1 }
0x17fb   :  { %v2126_v6 = vadd.f32 %v2220_v8, %v2125_v7  ;;  %v2521_v9 = vpop.f32.mrb[19].mxu1 }
0x17fd   :  { %2130 = vst.msk [vmem:[#allocation2] sm:$0x3] %vm2129_vm11, %v2126_v6 }
0x17fe   :  { %2786 = shalt.err (!%p2783_p4)
}
0x17ff   :  { %s2787_s27 = scalar_lea.hbm %s3336_s15, 32 }
0x1800   :  { %p2788_p5 = scmp.ne.s32.totalorder %s3336_s15, %s2787_s27  ;;  %p2791_p6 = scmp.lt.u32.totalorder %s2787_s27, %s3336_s15 }
0x1802   :  { %p2793_p7 = pnand %p2791_p6, %p2788_p5 }
0x1804   :  { %2796 = shalt.err (!%p2793_p7)
}
0x1805   :  { %2140 = dma.vmem_to_hbm [thread:$0]  %s2138_s25, 32, %s3336_s15, [#allocation3]  }
0x1806   :  { %2797 = dma.done.wait [#allocation3], 32  }
0x1807   :  { %2798 = vsyncadd [#allocation3], 4294967264 }
0x1808   :  { %2144 = vsyncpa [#allocation3], 1 }

</bundles_post_ra>
